<compile_context>
chip_gen: v7x
topology: tpu7x:2x2x1
jax: 0.10.0
libtpu: 0.0.40
codegen_flags: <defaults>
</compile_context>

<pallas_src>
import functools

import jax
import jax.numpy as jnp
from jax.experimental import pallas as pl
from jax.experimental.pallas import tpu as pltpu


_CompilerParams = getattr(pltpu, "CompilerParams", None)
if _CompilerParams is None:  # very old JAX fallback
    _CompilerParams = getattr(pltpu, "TPUCompilerParams")


# ----------------------------------------------------------------------------
# Kernel: one (batch, head) grid step
# ----------------------------------------------------------------------------
def _mha_kernel(x_ref, wq_ref, bq_ref, wk_ref, wv_ref, bv_ref, wo_ref, bo_ref,
                *rest, scale, n_head, has_mask, return_qk, approx_recip):
    # x_ref    : (1, T, D)    tokens for this batch row (compute dtype)
    # w*_ref   : (D, D)       projection weights (compute dtype)
    # b*_ref   : (1, D)       biases (f32)
    # mask_ref : (T, T)       additive f32 mask                (iff has_mask)
    # o_ref    : (1, T, D)    attention output (written at last head)
    # qk_ref   : (1, 1, T, T) f32 pre-softmax scores, head h   (iff return_qk)
    # q_s/k_s/v_s/wv_s : (H, T, hd) head-major VMEM scratch (compute dtype)
    idx = 0
    mask_ref = None
    if has_mask:
        mask_ref = rest[idx]
        idx += 1
    o_ref = rest[idx]
    idx += 1
    qk_ref = None
    if return_qk:
        qk_ref = rest[idx]
        idx += 1
    q_s, k_s, v_s, wv_s = rest[idx:idx + 4]

    h = pl.program_id(1)
    T, D = x_ref.shape[1], x_ref.shape[2]
    hd = D // n_head
    cdt = q_s.dtype
    f32 = jnp.float32

    # ---- Once per batch row (h == 0): full-width QKV projections -----------
    @pl.when(h == 0)
    def _project():
        x = x_ref[0]                                                  # (T, D)
        q = jnp.dot(x, wq_ref[...], preferred_element_type=f32) + bq_ref[...]
        k = jnp.dot(x, wk_ref[...], preferred_element_type=f32)
        v = jnp.dot(x, wv_ref[...], preferred_element_type=f32) + bv_ref[...]
        q = q * scale          # hd**-0.25 on q and k  ==  hd**-0.5 on q alone
        # Single cast to compute dtype + head-major layout: per-head access
        # below is plain leading-dim indexing (no lane slices in the hot path).
        for i in range(n_head):                       # static, once per batch
            sl = slice(i * hd, (i + 1) * hd)
            q_s[i] = q[:, sl].astype(cdt)
            k_s[i] = k[:, sl].astype(cdt)
            v_s[i] = v[:, sl].astype(cdt)

    # ---- Per (batch, head) step: attention for head h -----------------------
    q_h = q_s[h]                                                     # (T, hd)
    k_h = k_s[h]
    v_h = v_s[h]

    # scores = q_h @ k_h.T : contract on head dim (no per-head transpose).
    scores = jax.lax.dot_general(q_h, k_h, (((1,), (1,)), ((), ())),
                                 preferred_element_type=f32)         # (T, T)
    if has_mask:
        scores = scores + mask_ref[...]
    if return_qk:
        qk_ref[0, 0] = scores           # per-head (1,1,T,T) f32 block

    # Row-wise softmax.  Clamps guard fully-masked rows (-> zeros, not NaN).
    m = jnp.max(scores, axis=-1, keepdims=True)
    m = jnp.maximum(m, jnp.float32(-1e30))
    p = jnp.exp(scores - m)
    l = jnp.maximum(jnp.sum(p, axis=-1, keepdims=True), jnp.float32(1e-30))
    if hasattr(pl, "reciprocal"):
        inv = pl.reciprocal(l, approx=approx_recip)   # EUP reciprocal + mul
    else:
        inv = 1.0 / l
    w = p * inv

    wv_h = jnp.dot(w.astype(cdt), v_h, preferred_element_type=f32)   # (T, hd)
    wv_s[h] = wv_h.astype(cdt)

    # ---- After the last head: assemble (T, D) slab + ONE K=D projection ----
    @pl.when(h == n_head - 1)
    def _finalize():
        wv_all = jnp.concatenate([wv_s[i] for i in range(n_head)], axis=-1)
        out = jnp.dot(wv_all, wo_ref[...], preferred_element_type=f32)
        o_ref[0] = (out + bo_ref[...]).astype(o_ref.dtype)


# ----------------------------------------------------------------------------
# Wrapper
# ----------------------------------------------------------------------------
def _vmem_limit_bytes():
    """Generation-aware scoped-VMEM limit (no hard-coded 48 MiB)."""
    try:
        cap = int(pltpu.get_tpu_info().vmem_capacity_bytes)
        # ~108 MiB on 128-MiB chips (v5e/v6e), ~54 MiB on 64-MiB chips (v7x).
        return min(int(cap * 0.85), 112 * 1024 * 1024)
    except Exception:
        return None   # fall back to the compiler default


def multi_head_attention(x, params, n_head, mask=None, *,
                         compute_dtype=jnp.bfloat16, return_qk=True):
    """Whisper-style self-attention forward.

    Returns (out, qk) like the PyTorch module when return_qk=True, else out.
    compute_dtype sets the MXU operand dtype (f32 accumulation); out keeps
    x.dtype and qk is f32. Pass compute_dtype=jnp.float32 for bit-faithful
    scores; with the bf16 default, qk reflects bf16 q/k matmuls.
    """
    B, T, D = x.shape
    assert D % n_head == 0, "n_state must be divisible by n_head"
    hd = D // n_head
    scale = float(hd) ** (-0.5)        # hd**-0.25 applied to both q and k
    f32 = jnp.float32
    cdt = x.dtype if compute_dtype is None else compute_dtype
    approx_recip = (cdt != jnp.float32)
    has_mask = mask is not None

    xc = x.astype(cdt)
    wq = params["wq"].astype(cdt)
    wk = params["wk"].astype(cdt)
    wv = params["wv"].astype(cdt)
    wo = params["wout"].astype(cdt)
    bq = params["bq"].reshape(1, D).astype(f32)
    bv = params["bv"].reshape(1, D).astype(f32)
    bo = params["bout"].reshape(1, D).astype(f32)
    args = [xc, wq, bq, wk, wv, bv, wo, bo]
    if has_mask:
        args.append(mask[:T, :T].astype(f32))

    kernel = functools.partial(
        _mha_kernel, scale=scale, n_head=n_head, has_mask=has_mask,
        return_qk=return_qk, approx_recip=approx_recip)

    o_shape = jax.ShapeDtypeStruct((B, T, D), x.dtype)
    qk_shape = jax.ShapeDtypeStruct((B, n_head, T, T), f32)

    def build_and_run(single_buffer_invariants):
        # Grid-invariant blocks (weights/biases/mask) don't need double
        # buffering; Buffered(1) halves their VMEM footprint.
        inv_kw = ({"pipeline_mode": pl.Buffered(1)}
                  if single_buffer_invariants else {})
        in_specs = [
            pl.BlockSpec((1, T, D), lambda b, h: (b, 0, 0)),           # x
            pl.BlockSpec((D, D), lambda b, h: (0, 0), **inv_kw),       # wq
            pl.BlockSpec((1, D), lambda b, h: (0, 0), **inv_kw),       # bq
            pl.BlockSpec((D, D), lambda b, h: (0, 0), **inv_kw),       # wk
            pl.BlockSpec((D, D), lambda b, h: (0, 0), **inv_kw),       # wv
            pl.BlockSpec((1, D), lambda b, h: (0, 0), **inv_kw),       # bv
            pl.BlockSpec((D, D), lambda b, h: (0, 0), **inv_kw),       # wout
            pl.BlockSpec((1, D), lambda b, h: (0, 0), **inv_kw),       # bout
        ]
        if has_mask:
            in_specs.append(
                pl.BlockSpec((T, T), lambda b, h: (0, 0), **inv_kw))   # mask

        o_spec = pl.BlockSpec((1, T, D), lambda b, h: (b, 0, 0))
        if return_qk:
            out_shape = (o_shape, qk_shape)
            out_specs = (o_spec,
                         pl.BlockSpec((1, 1, T, T), lambda b, h: (b, h, 0, 0)))
        else:
            out_shape = o_shape
            out_specs = o_spec

        fn = pl.pallas_call(
            kernel,
            out_shape=out_shape,
            grid=(B, n_head),
            in_specs=in_specs,
            out_specs=out_specs,
            scratch_shapes=[pltpu.VMEM((n_head, T, hd), cdt)] * 4,
            compiler_params=_CompilerParams(
                dimension_semantics=("parallel", "arbitrary"),
                vmem_limit_bytes=_vmem_limit_bytes()),
        )
        return fn(*args)

    try:
        res = build_and_run(True)
        jax.block_until_ready(res)
        return res
    except Exception:
        # pipeline_mode=pl.Buffered(1) unsupported on this JAX version.
        return build_and_run(False)


# ----------------------------------------------------------------------------
# Pure-JAX reference (mirrors the PyTorch module)
# ----------------------------------------------------------------------------
def _reference(x, params, n_head, mask=None):
    B, T, D = x.shape
    hd = D // n_head
    scale = float(hd) ** (-0.25)
    q = x @ params["wq"] + params["bq"]
    k = x @ params["wk"]
    v = x @ params["wv"] + params["bv"]
    q = q.reshape(B, T, n_head, hd).transpose(0, 2, 1, 3) * scale
    k = k.reshape(B, T, n_head, hd).transpose(0, 2, 3, 1) * scale
    v = v.reshape(B, T, n_head, hd).transpose(0, 2, 1, 3)
    qk = jnp.einsum("bhtd,bhds->bhts", q, k)
    if mask is not None:
        qk = qk + mask[:T, :T]
    qk = qk.astype(jnp.float32)
    w = jax.nn.softmax(qk, axis=-1).astype(q.dtype)
    wv = jnp.einsum("bhts,bhsd->bhtd", w, v)
    wv = wv.transpose(0, 2, 1, 3).reshape(B, T, D)
    return wv @ params["wout"] + params["bout"], qk


if __name__ == "__main__":
    B, T, D, H = 2, 8, 32, 4

    key = jax.random.PRNGKey(0)
    ks = jax.random.split(key, 8)
    s = 1.0 / (D ** 0.5)
    params = {
        "wq":   jax.random.normal(ks[0], (D, D), jnp.float32) * s,
        "bq":   jax.random.normal(ks[1], (D,), jnp.float32) * s,
        "wk":   jax.random.normal(ks[2], (D, D), jnp.float32) * s,
        "wv":   jax.random.normal(ks[3], (D, D), jnp.float32) * s,
        "bv":   jax.random.normal(ks[4], (D,), jnp.float32) * s,
        "wout": jax.random.normal(ks[5], (D, D), jnp.float32) * s,
        "bout": jax.random.normal(ks[6], (D,), jnp.float32) * s,
    }
    x = jax.random.normal(ks[7], (B, T, D), jnp.float32)
    # Causal mask like Whisper's decoder mask.
    mask = jnp.triu(jnp.full((T, T), -jnp.inf, jnp.float32), k=1)

    out_ref, qk_ref = _reference(x, params, H, mask=mask)

    # 1) Exact-precision path (f32 MXU operands), with mask, qk returned.
    out, qk = multi_head_attention(x, params, H, mask=mask,
                                   compute_dtype=jnp.float32)
    jax.block_until_ready((out, qk))
    assert out.shape == (B, T, D) and qk.shape == (B, H, T, T)
    assert jnp.allclose(out, out_ref, atol=1e-4, rtol=1e-4)
    assert jnp.allclose(qk, qk_ref, atol=1e-4, rtol=1e-4)

    # 2) f32 path, no mask (exercises the no-mask specialization).
    out_nm, qk_nm = multi_head_attention(x, params, H, mask=None,
                                         compute_dtype=jnp.float32)
    jax.block_until_ready((out_nm, qk_nm))
    out_nm_ref, qk_nm_ref = _reference(x, params, H, mask=None)
    assert jnp.allclose(out_nm, out_nm_ref, atol=1e-4, rtol=1e-4)
    assert jnp.allclose(qk_nm, qk_nm_ref, atol=1e-4, rtol=1e-4)

    # 3) Default bf16-operand path (f32 accumulation) — loose tolerance.
    out_bf, qk_bf = multi_head_attention(x, params, H, mask=mask)
    jax.block_until_ready((out_bf, qk_bf))
    assert float(jnp.max(jnp.abs(out_bf.astype(jnp.float32) - out_ref))) < 0.3
    qk_diff = jnp.where(jnp.isfinite(qk_ref), qk_bf - qk_ref, 0.0)
    assert float(jnp.max(jnp.abs(qk_diff))) < 0.5

    # 4) qk output disabled (no (B,H,T,T) HBM writeback at all).
    out_only = multi_head_attention(x, params, H, mask=mask,
                                    compute_dtype=jnp.float32, return_qk=False)
    jax.block_until_ready(out_only)
    assert jnp.allclose(out_only, out_ref, atol=1e-4, rtol=1e-4)

    print("KERNEL_OK")
</pallas_src>

<mosaic_0001>
module attributes {stable_mosaic.version = 11 : i64} {
  func.func @_mha_kernel(%arg0: i32, %arg1: i32, %arg2: memref<1x8x32xf32, #tpu.memory_space<vmem>>, %arg3: memref<32x32xf32, #tpu.memory_space<vmem>>, %arg4: memref<1x32xf32, #tpu.memory_space<vmem>>, %arg5: memref<32x32xf32, #tpu.memory_space<vmem>>, %arg6: memref<32x32xf32, #tpu.memory_space<vmem>>, %arg7: memref<1x32xf32, #tpu.memory_space<vmem>>, %arg8: memref<32x32xf32, #tpu.memory_space<vmem>>, %arg9: memref<1x32xf32, #tpu.memory_space<vmem>>, %arg10: memref<8x8xf32, #tpu.memory_space<vmem>>, %arg11: memref<1x8x32xf32, #tpu.memory_space<vmem>>, %arg12: memref<1x1x8x8xf32, #tpu.memory_space<vmem>>, %arg13: memref<4x8x8xf32, #tpu.memory_space<vmem>>, %arg14: memref<4x8x8xf32, #tpu.memory_space<vmem>>, %arg15: memref<4x8x8xf32, #tpu.memory_space<vmem>>, %arg16: memref<4x8x8xf32, #tpu.memory_space<vmem>>) attributes {dimension_semantics = [#tpu.dimension_semantics<parallel>, #tpu.dimension_semantics<arbitrary>], iteration_bounds = array<i64: 2, 4>, scalar_prefetch = 0 : i64, scratch_operands = 4 : i64, tpu.core_type = #tpu.core_type<tc>, window_params = [{transform_indices = @transform_0, window_bounds = array<i64: 1, 8, 32>}, {pipeline_mode = #tpu.pipeline_mode<synchronous>, transform_indices = @transform_1, window_bounds = array<i64: 32, 32>}, {pipeline_mode = #tpu.pipeline_mode<synchronous>, transform_indices = @transform_2, window_bounds = array<i64: 1, 32>}, {pipeline_mode = #tpu.pipeline_mode<synchronous>, transform_indices = @transform_3, window_bounds = array<i64: 32, 32>}, {pipeline_mode = #tpu.pipeline_mode<synchronous>, transform_indices = @transform_4, window_bounds = array<i64: 32, 32>}, {pipeline_mode = #tpu.pipeline_mode<synchronous>, transform_indices = @transform_5, window_bounds = array<i64: 1, 32>}, {pipeline_mode = #tpu.pipeline_mode<synchronous>, transform_indices = @transform_6, window_bounds = array<i64: 32, 32>}, {pipeline_mode = #tpu.pipeline_mode<synchronous>, transform_indices = @transform_7, window_bounds = array<i64: 1, 32>}, {pipeline_mode = #tpu.pipeline_mode<synchronous>, transform_indices = @transform_8, window_bounds = array<i64: 8, 8>}, {transform_indices = @transform_9, window_bounds = array<i64: 1, 8, 32>}, {transform_indices = @transform_10, window_bounds = array<i64: 1, 1, 8, 8>}]} {
    %c0_i32 = arith.constant 0 : i32
    %0 = arith.cmpi eq, %arg1, %c0_i32 : i32
    %1 = arith.extui %0 : i1 to i32
    %c0_i32_0 = arith.constant 0 : i32
    %2 = arith.cmpi ne, %1, %c0_i32_0 : i32
    scf.if %2 {
      %c0_20 = arith.constant 0 : index
      %c0_21 = arith.constant 0 : index
      %c0_22 = arith.constant 0 : index
      %40 = vector.load %arg2[%c0_20, %c0_21, %c0_22] : memref<1x8x32xf32, #tpu.memory_space<vmem>>, vector<1x8x32xf32>
      %41 = vector.shape_cast %40 : vector<1x8x32xf32> to vector<8x32xf32>
      %c0_23 = arith.constant 0 : index
      %c0_24 = arith.constant 0 : index
      %42 = vector.load %arg3[%c0_23, %c0_24] : memref<32x32xf32, #tpu.memory_space<vmem>>, vector<32x32xf32>
      %cst_25 = arith.constant dense<0.000000e+00> : vector<8x32xf32>
      %43 = tpu.matmul %41, %42, %cst_25 {dimension_numbers = #tpu.dot_dimension_numbers<[1], [0], [0], [1], [0, 0, 1, 1], [], []>} : vector<8x32xf32>, vector<32x32xf32>, vector<8x32xf32> -> vector<8x32xf32>
      %c0_26 = arith.constant 0 : index
      %c0_27 = arith.constant 0 : index
      %44 = vector.load %arg4[%c0_26, %c0_27] : memref<1x32xf32, #tpu.memory_space<vmem>>, vector<1x32xf32>
      %45 = vector.broadcast %44 : vector<1x32xf32> to vector<8x32xf32>
      %46 = arith.addf %43, %45 : vector<8x32xf32>
      %c0_28 = arith.constant 0 : index
      %c0_29 = arith.constant 0 : index
      %47 = vector.load %arg5[%c0_28, %c0_29] : memref<32x32xf32, #tpu.memory_space<vmem>>, vector<32x32xf32>
      %cst_30 = arith.constant dense<0.000000e+00> : vector<8x32xf32>
      %48 = tpu.matmul %41, %47, %cst_30 {dimension_numbers = #tpu.dot_dimension_numbers<[1], [0], [0], [1], [0, 0, 1, 1], [], []>} : vector<8x32xf32>, vector<32x32xf32>, vector<8x32xf32> -> vector<8x32xf32>
      %c0_31 = arith.constant 0 : index
      %c0_32 = arith.constant 0 : index
      %49 = vector.load %arg6[%c0_31, %c0_32] : memref<32x32xf32, #tpu.memory_space<vmem>>, vector<32x32xf32>
      %cst_33 = arith.constant dense<0.000000e+00> : vector<8x32xf32>
      %50 = tpu.matmul %41, %49, %cst_33 {dimension_numbers = #tpu.dot_dimension_numbers<[1], [0], [0], [1], [0, 0, 1, 1], [], []>} : vector<8x32xf32>, vector<32x32xf32>, vector<8x32xf32> -> vector<8x32xf32>
      %c0_34 = arith.constant 0 : index
      %c0_35 = arith.constant 0 : index
      %51 = vector.load %arg7[%c0_34, %c0_35] : memref<1x32xf32, #tpu.memory_space<vmem>>, vector<1x32xf32>
      %52 = vector.broadcast %51 : vector<1x32xf32> to vector<8x32xf32>
      %53 = arith.addf %50, %52 : vector<8x32xf32>
      %cst_36 = arith.constant 0.353553385 : f32
      %54 = vector.broadcast %cst_36 : f32 to vector<8x32xf32>
      %55 = arith.mulf %46, %54 : vector<8x32xf32>
      %56 = vector.extract_strided_slice %55 {offsets = [0, 0], sizes = [8, 8], strides = [1, 1]} : vector<8x32xf32> to vector<8x8xf32>
      %c0_37 = arith.constant 0 : index
      %c0_38 = arith.constant 0 : index
      %c0_39 = arith.constant 0 : index
      %57 = vector.load %arg13[%c0_37, %c0_38, %c0_39] : memref<4x8x8xf32, #tpu.memory_space<vmem>>, vector<1x8x8xf32>
      %58 = vector.shape_cast %57 : vector<1x8x8xf32> to vector<8x8xf32>
      %59 = vector.shape_cast %56 : vector<8x8xf32> to vector<1x8x8xf32>
      tpu.vector_store %arg13[%c0_37, %c0_38, %c0_39], %59 {strides = array<i32>} : memref<4x8x8xf32, #tpu.memory_space<vmem>>, vector<1x8x8xf32>,
      %60 = vector.extract_strided_slice %48 {offsets = [0, 0], sizes = [8, 8], strides = [1, 1]} : vector<8x32xf32> to vector<8x8xf32>
      %c0_40 = arith.constant 0 : index
      %c0_41 = arith.constant 0 : index
      %c0_42 = arith.constant 0 : index
      %61 = vector.load %arg14[%c0_40, %c0_41, %c0_42] : memref<4x8x8xf32, #tpu.memory_space<vmem>>, vector<1x8x8xf32>
      %62 = vector.shape_cast %61 : vector<1x8x8xf32> to vector<8x8xf32>
      %63 = vector.shape_cast %60 : vector<8x8xf32> to vector<1x8x8xf32>
      tpu.vector_store %arg14[%c0_40, %c0_41, %c0_42], %63 {strides = array<i32>} : memref<4x8x8xf32, #tpu.memory_space<vmem>>, vector<1x8x8xf32>,
      %64 = vector.extract_strided_slice %53 {offsets = [0, 0], sizes = [8, 8], strides = [1, 1]} : vector<8x32xf32> to vector<8x8xf32>
      %c0_43 = arith.constant 0 : index
      %c0_44 = arith.constant 0 : index
      %c0_45 = arith.constant 0 : index
      %65 = vector.load %arg15[%c0_43, %c0_44, %c0_45] : memref<4x8x8xf32, #tpu.memory_space<vmem>>, vector<1x8x8xf32>
      %66 = vector.shape_cast %65 : vector<1x8x8xf32> to vector<8x8xf32>
      %67 = vector.shape_cast %64 : vector<8x8xf32> to vector<1x8x8xf32>
      tpu.vector_store %arg15[%c0_43, %c0_44, %c0_45], %67 {strides = array<i32>} : memref<4x8x8xf32, #tpu.memory_space<vmem>>, vector<1x8x8xf32>,
      %68 = vector.extract_strided_slice %55 {offsets = [0, 8], sizes = [8, 8], strides = [1, 1]} : vector<8x32xf32> to vector<8x8xf32>
      %c1 = arith.constant 1 : index
      %c0_46 = arith.constant 0 : index
      %c0_47 = arith.constant 0 : index
      %69 = vector.load %arg13[%c1, %c0_46, %c0_47] : memref<4x8x8xf32, #tpu.memory_space<vmem>>, vector<1x8x8xf32>
      %70 = vector.shape_cast %69 : vector<1x8x8xf32> to vector<8x8xf32>
      %71 = vector.shape_cast %68 : vector<8x8xf32> to vector<1x8x8xf32>
      tpu.vector_store %arg13[%c1, %c0_46, %c0_47], %71 {strides = array<i32>} : memref<4x8x8xf32, #tpu.memory_space<vmem>>, vector<1x8x8xf32>,
      %72 = vector.extract_strided_slice %48 {offsets = [0, 8], sizes = [8, 8], strides = [1, 1]} : vector<8x32xf32> to vector<8x8xf32>
      %c1_48 = arith.constant 1 : index
      %c0_49 = arith.constant 0 : index
      %c0_50 = arith.constant 0 : index
      %73 = vector.load %arg14[%c1_48, %c0_49, %c0_50] : memref<4x8x8xf32, #tpu.memory_space<vmem>>, vector<1x8x8xf32>
      %74 = vector.shape_cast %73 : vector<1x8x8xf32> to vector<8x8xf32>
      %75 = vector.shape_cast %72 : vector<8x8xf32> to vector<1x8x8xf32>
      tpu.vector_store %arg14[%c1_48, %c0_49, %c0_50], %75 {strides = array<i32>} : memref<4x8x8xf32, #tpu.memory_space<vmem>>, vector<1x8x8xf32>,
      %76 = vector.extract_strided_slice %53 {offsets = [0, 8], sizes = [8, 8], strides = [1, 1]} : vector<8x32xf32> to vector<8x8xf32>
      %c1_51 = arith.constant 1 : index
      %c0_52 = arith.constant 0 : index
      %c0_53 = arith.constant 0 : index
      %77 = vector.load %arg15[%c1_51, %c0_52, %c0_53] : memref<4x8x8xf32, #tpu.memory_space<vmem>>, vector<1x8x8xf32>
      %78 = vector.shape_cast %77 : vector<1x8x8xf32> to vector<8x8xf32>
      %79 = vector.shape_cast %76 : vector<8x8xf32> to vector<1x8x8xf32>
      tpu.vector_store %arg15[%c1_51, %c0_52, %c0_53], %79 {strides = array<i32>} : memref<4x8x8xf32, #tpu.memory_space<vmem>>, vector<1x8x8xf32>,
      %80 = vector.extract_strided_slice %55 {offsets = [0, 16], sizes = [8, 8], strides = [1, 1]} : vector<8x32xf32> to vector<8x8xf32>
      %c2 = arith.constant 2 : index
      %c0_54 = arith.constant 0 : index
      %c0_55 = arith.constant 0 : index
      %81 = vector.load %arg13[%c2, %c0_54, %c0_55] : memref<4x8x8xf32, #tpu.memory_space<vmem>>, vector<1x8x8xf32>
      %82 = vector.shape_cast %81 : vector<1x8x8xf32> to vector<8x8xf32>
      %83 = vector.shape_cast %80 : vector<8x8xf32> to vector<1x8x8xf32>
      tpu.vector_store %arg13[%c2, %c0_54, %c0_55], %83 {strides = array<i32>} : memref<4x8x8xf32, #tpu.memory_space<vmem>>, vector<1x8x8xf32>,
      %84 = vector.extract_strided_slice %48 {offsets = [0, 16], sizes = [8, 8], strides = [1, 1]} : vector<8x32xf32> to vector<8x8xf32>
      %c2_56 = arith.constant 2 : index
      %c0_57 = arith.constant 0 : index
      %c0_58 = arith.constant 0 : index
      %85 = vector.load %arg14[%c2_56, %c0_57, %c0_58] : memref<4x8x8xf32, #tpu.memory_space<vmem>>, vector<1x8x8xf32>
      %86 = vector.shape_cast %85 : vector<1x8x8xf32> to vector<8x8xf32>
      %87 = vector.shape_cast %84 : vector<8x8xf32> to vector<1x8x8xf32>
      tpu.vector_store %arg14[%c2_56, %c0_57, %c0_58], %87 {strides = array<i32>} : memref<4x8x8xf32, #tpu.memory_space<vmem>>, vector<1x8x8xf32>,
      %88 = vector.extract_strided_slice %53 {offsets = [0, 16], sizes = [8, 8], strides = [1, 1]} : vector<8x32xf32> to vector<8x8xf32>
      %c2_59 = arith.constant 2 : index
      %c0_60 = arith.constant 0 : index
      %c0_61 = arith.constant 0 : index
      %89 = vector.load %arg15[%c2_59, %c0_60, %c0_61] : memref<4x8x8xf32, #tpu.memory_space<vmem>>, vector<1x8x8xf32>
      %90 = vector.shape_cast %89 : vector<1x8x8xf32> to vector<8x8xf32>
      %91 = vector.shape_cast %88 : vector<8x8xf32> to vector<1x8x8xf32>
      tpu.vector_store %arg15[%c2_59, %c0_60, %c0_61], %91 {strides = array<i32>} : memref<4x8x8xf32, #tpu.memory_space<vmem>>, vector<1x8x8xf32>,
      %92 = vector.extract_strided_slice %55 {offsets = [0, 24], sizes = [8, 8], strides = [1, 1]} : vector<8x32xf32> to vector<8x8xf32>
      %c3 = arith.constant 3 : index
      %c0_62 = arith.constant 0 : index
      %c0_63 = arith.constant 0 : index
      %93 = vector.load %arg13[%c3, %c0_62, %c0_63] : memref<4x8x8xf32, #tpu.memory_space<vmem>>, vector<1x8x8xf32>
      %94 = vector.shape_cast %93 : vector<1x8x8xf32> to vector<8x8xf32>
      %95 = vector.shape_cast %92 : vector<8x8xf32> to vector<1x8x8xf32>
      tpu.vector_store %arg13[%c3, %c0_62, %c0_63], %95 {strides = array<i32>} : memref<4x8x8xf32, #tpu.memory_space<vmem>>, vector<1x8x8xf32>,
      %96 = vector.extract_strided_slice %48 {offsets = [0, 24], sizes = [8, 8], strides = [1, 1]} : vector<8x32xf32> to vector<8x8xf32>
      %c3_64 = arith.constant 3 : index
      %c0_65 = arith.constant 0 : index
      %c0_66 = arith.constant 0 : index
      %97 = vector.load %arg14[%c3_64, %c0_65, %c0_66] : memref<4x8x8xf32, #tpu.memory_space<vmem>>, vector<1x8x8xf32>
      %98 = vector.shape_cast %97 : vector<1x8x8xf32> to vector<8x8xf32>
      %99 = vector.shape_cast %96 : vector<8x8xf32> to vector<1x8x8xf32>
      tpu.vector_store %arg14[%c3_64, %c0_65, %c0_66], %99 {strides = array<i32>} : memref<4x8x8xf32, #tpu.memory_space<vmem>>, vector<1x8x8xf32>,
      %100 = vector.extract_strided_slice %53 {offsets = [0, 24], sizes = [8, 8], strides = [1, 1]} : vector<8x32xf32> to vector<8x8xf32>
      %c3_67 = arith.constant 3 : index
      %c0_68 = arith.constant 0 : index
      %c0_69 = arith.constant 0 : index
      %101 = vector.load %arg15[%c3_67, %c0_68, %c0_69] : memref<4x8x8xf32, #tpu.memory_space<vmem>>, vector<1x8x8xf32>
      %102 = vector.shape_cast %101 : vector<1x8x8xf32> to vector<8x8xf32>
      %103 = vector.shape_cast %100 : vector<8x8xf32> to vector<1x8x8xf32>
      tpu.vector_store %arg15[%c3_67, %c0_68, %c0_69], %103 {strides = array<i32>} : memref<4x8x8xf32, #tpu.memory_space<vmem>>, vector<1x8x8xf32>,
    } else {
    }
    %3 = arith.index_cast %arg1 : i32 to index
    %c0 = arith.constant 0 : index
    %c0_1 = arith.constant 0 : index
    %4 = vector.load %arg13[%3, %c0, %c0_1] : memref<4x8x8xf32, #tpu.memory_space<vmem>>, vector<1x8x8xf32>
    %5 = vector.shape_cast %4 : vector<1x8x8xf32> to vector<8x8xf32>
    %6 = arith.index_cast %arg1 : i32 to index
    %c0_2 = arith.constant 0 : index
    %c0_3 = arith.constant 0 : index
    %7 = vector.load %arg14[%6, %c0_2, %c0_3] : memref<4x8x8xf32, #tpu.memory_space<vmem>>, vector<1x8x8xf32>
    %8 = vector.shape_cast %7 : vector<1x8x8xf32> to vector<8x8xf32>
    %9 = arith.index_cast %arg1 : i32 to index
    %c0_4 = arith.constant 0 : index
    %c0_5 = arith.constant 0 : index
    %10 = vector.load %arg15[%9, %c0_4, %c0_5] : memref<4x8x8xf32, #tpu.memory_space<vmem>>, vector<1x8x8xf32>
    %11 = vector.shape_cast %10 : vector<1x8x8xf32> to vector<8x8xf32>
    %cst = arith.constant dense<0.000000e+00> : vector<8x8xf32>
    %12 = tpu.matmul %5, %8, %cst {dimension_numbers = #tpu.dot_dimension_numbers<[1], [1], [0], [0], [0, 0, 1, 0], [], []>} : vector<8x8xf32>, vector<8x8xf32>, vector<8x8xf32> -> vector<8x8xf32>
    %c0_6 = arith.constant 0 : index
    %c0_7 = arith.constant 0 : index
    %13 = vector.load %arg10[%c0_6, %c0_7] : memref<8x8xf32, #tpu.memory_space<vmem>>, vector<8x8xf32>
    %14 = arith.addf %12, %13 : vector<8x8xf32>
    %c0_8 = arith.constant 0 : index
    %c0_9 = arith.constant 0 : index
    %c0_10 = arith.constant 0 : index
    %c0_11 = arith.constant 0 : index
    %15 = vector.load %arg12[%c0_8, %c0_9, %c0_10, %c0_11] : memref<1x1x8x8xf32, #tpu.memory_space<vmem>>, vector<1x1x8x8xf32>
    %16 = vector.shape_cast %15 : vector<1x1x8x8xf32> to vector<8x8xf32>
    %17 = vector.shape_cast %14 : vector<8x8xf32> to vector<1x1x8x8xf32>
    tpu.vector_store %arg12[%c0_8, %c0_9, %c0_10, %c0_11], %17 {strides = array<i32>} : memref<1x1x8x8xf32, #tpu.memory_space<vmem>>, vector<1x1x8x8xf32>,
    %cst_12 = arith.constant dense<0xFF800000> : vector<8xf32>
    %18 = vector.multi_reduction <maximumf>, %14, %cst_12 [1] : vector<8x8xf32> to vector<8xf32>
    %19 = vector.shape_cast %18 : vector<8xf32> to vector<8x1xf32>
    %cst_13 = arith.constant -1.000000e+30 : f32
    %20 = vector.broadcast %cst_13 : f32 to vector<8x1xf32>
    %21 = arith.maximumf %19, %20 : vector<8x1xf32>
    %22 = vector.broadcast %21 : vector<8x1xf32> to vector<8x8xf32>
    %23 = arith.subf %14, %22 : vector<8x8xf32>
    %24 = math.exp %23 : vector<8x8xf32>
    %cst_14 = arith.constant dense<0.000000e+00> : vector<8xf32>
    %25 = vector.multi_reduction <add>, %24, %cst_14 [1] : vector<8x8xf32> to vector<8xf32>
    %26 = vector.shape_cast %25 : vector<8xf32> to vector<8x1xf32>
    %cst_15 = arith.constant 1.000000e-30 : f32
    %27 = vector.broadcast %cst_15 : f32 to vector<8x1xf32>
    %28 = arith.maximumf %26, %27 : vector<8x1xf32>
    %29 = tpu.reciprocal %28 : vector<8x1xf32> -> vector<8x1xf32>
    %30 = vector.broadcast %29 : vector<8x1xf32> to vector<8x8xf32>
    %31 = arith.mulf %24, %30 : vector<8x8xf32>
    %cst_16 = arith.constant dense<0.000000e+00> : vector<8x8xf32>
    %32 = tpu.matmul %31, %11, %cst_16 {dimension_numbers = #tpu.dot_dimension_numbers<[1], [0], [0], [1], [0, 0, 1, 1], [], []>} : vector<8x8xf32>, vector<8x8xf32>, vector<8x8xf32> -> vector<8x8xf32>
    %33 = arith.index_cast %arg1 : i32 to index
    %c0_17 = arith.constant 0 : index
    %c0_18 = arith.constant 0 : index
    %34 = vector.load %arg16[%33, %c0_17, %c0_18] : memref<4x8x8xf32, #tpu.memory_space<vmem>>, vector<1x8x8xf32>
    %35 = vector.shape_cast %34 : vector<1x8x8xf32> to vector<8x8xf32>
    %36 = vector.shape_cast %32 : vector<8x8xf32> to vector<1x8x8xf32>
    tpu.vector_store %arg16[%33, %c0_17, %c0_18], %36 {strides = array<i32>} : memref<4x8x8xf32, #tpu.memory_space<vmem>>, vector<1x8x8xf32>,
    %c3_i32 = arith.constant 3 : i32
    %37 = arith.cmpi eq, %arg1, %c3_i32 : i32
    %38 = arith.extui %37 : i1 to i32
    %c0_i32_19 = arith.constant 0 : i32
    %39 = arith.cmpi ne, %38, %c0_i32_19 : i32
    scf.if %39 {
      %c0_20 = arith.constant 0 : index
      %c0_21 = arith.constant 0 : index
      %c0_22 = arith.constant 0 : index
      %40 = vector.load %arg16[%c0_20, %c0_21, %c0_22] : memref<4x8x8xf32, #tpu.memory_space<vmem>>, vector<1x8x8xf32>
      %41 = vector.shape_cast %40 : vector<1x8x8xf32> to vector<8x8xf32>
      %c1 = arith.constant 1 : index
      %c0_23 = arith.constant 0 : index
      %c0_24 = arith.constant 0 : index
      %42 = vector.load %arg16[%c1, %c0_23, %c0_24] : memref<4x8x8xf32, #tpu.memory_space<vmem>>, vector<1x8x8xf32>
      %43 = vector.shape_cast %42 : vector<1x8x8xf32> to vector<8x8xf32>
      %c2 = arith.constant 2 : index
      %c0_25 = arith.constant 0 : index
      %c0_26 = arith.constant 0 : index
      %44 = vector.load %arg16[%c2, %c0_25, %c0_26] : memref<4x8x8xf32, #tpu.memory_space<vmem>>, vector<1x8x8xf32>
      %45 = vector.shape_cast %44 : vector<1x8x8xf32> to vector<8x8xf32>
      %c3 = arith.constant 3 : index
      %c0_27 = arith.constant 0 : index
      %c0_28 = arith.constant 0 : index
      %46 = vector.load %arg16[%c3, %c0_27, %c0_28] : memref<4x8x8xf32, #tpu.memory_space<vmem>>, vector<1x8x8xf32>
      %47 = vector.shape_cast %46 : vector<1x8x8xf32> to vector<8x8xf32>
      %48 = tpu.concatenate %41, %43, %45, %47 in 1 : vector<8x8xf32>, vector<8x8xf32>, vector<8x8xf32>, vector<8x8xf32> -> vector<8x32xf32>
      %c0_29 = arith.constant 0 : index
      %c0_30 = arith.constant 0 : index
      %49 = vector.load %arg8[%c0_29, %c0_30] : memref<32x32xf32, #tpu.memory_space<vmem>>, vector<32x32xf32>
      %cst_31 = arith.constant dense<0.000000e+00> : vector<8x32xf32>
      %50 = tpu.matmul %48, %49, %cst_31 {dimension_numbers = #tpu.dot_dimension_numbers<[1], [0], [0], [1], [0, 0, 1, 1], [], []>} : vector<8x32xf32>, vector<32x32xf32>, vector<8x32xf32> -> vector<8x32xf32>
      %c0_32 = arith.constant 0 : index
      %c0_33 = arith.constant 0 : index
      %51 = vector.load %arg9[%c0_32, %c0_33] : memref<1x32xf32, #tpu.memory_space<vmem>>, vector<1x32xf32>
      %52 = vector.broadcast %51 : vector<1x32xf32> to vector<8x32xf32>
      %53 = arith.addf %50, %52 : vector<8x32xf32>
      %c0_34 = arith.constant 0 : index
      %c0_35 = arith.constant 0 : index
      %c0_36 = arith.constant 0 : index
      %54 = vector.load %arg11[%c0_34, %c0_35, %c0_36] : memref<1x8x32xf32, #tpu.memory_space<vmem>>, vector<1x8x32xf32>
      %55 = vector.shape_cast %54 : vector<1x8x32xf32> to vector<8x32xf32>
      %56 = vector.shape_cast %53 : vector<8x32xf32> to vector<1x8x32xf32>
      tpu.vector_store %arg11[%c0_34, %c0_35, %c0_36], %56 {strides = array<i32>} : memref<1x8x32xf32, #tpu.memory_space<vmem>>, vector<1x8x32xf32>,
    } else {
    }
    return
  }
  func.func @transform_0(%arg0: i32, %arg1: i32) -> (i32, i32, i32) {
    %c0_i32 = arith.constant 0 : i32
    %c0_i32_0 = arith.constant 0 : i32
    %c0_i32_1 = arith.constant 0 : i32
    return %arg0, %c0_i32, %c0_i32_0 : i32, i32, i32
  }
  func.func @transform_1(%arg0: i32, %arg1: i32) -> (i32, i32) {
    %c0_i32 = arith.constant 0 : i32
    %c0_i32_0 = arith.constant 0 : i32
    %c0_i32_1 = arith.constant 0 : i32
    return %c0_i32, %c0_i32_0 : i32, i32
  }
  func.func @transform_2(%arg0: i32, %arg1: i32) -> (i32, i32) {
    %c0_i32 = arith.constant 0 : i32
    %c0_i32_0 = arith.constant 0 : i32
    %c0_i32_1 = arith.constant 0 : i32
    return %c0_i32, %c0_i32_0 : i32, i32
  }
  func.func @transform_3(%arg0: i32, %arg1: i32) -> (i32, i32) {
    %c0_i32 = arith.constant 0 : i32
    %c0_i32_0 = arith.constant 0 : i32
    %c0_i32_1 = arith.constant 0 : i32
    return %c0_i32, %c0_i32_0 : i32, i32
  }
  func.func @transform_4(%arg0: i32, %arg1: i32) -> (i32, i32) {
    %c0_i32 = arith.constant 0 : i32
    %c0_i32_0 = arith.constant 0 : i32
    %c0_i32_1 = arith.constant 0 : i32
    return %c0_i32, %c0_i32_0 : i32, i32
  }
  func.func @transform_5(%arg0: i32, %arg1: i32) -> (i32, i32) {
    %c0_i32 = arith.constant 0 : i32
    %c0_i32_0 = arith.constant 0 : i32
    %c0_i32_1 = arith.constant 0 : i32
    return %c0_i32, %c0_i32_0 : i32, i32
  }
  func.func @transform_6(%arg0: i32, %arg1: i32) -> (i32, i32) {
    %c0_i32 = arith.constant 0 : i32
    %c0_i32_0 = arith.constant 0 : i32
    %c0_i32_1 = arith.constant 0 : i32
    return %c0_i32, %c0_i32_0 : i32, i32
  }
  func.func @transform_7(%arg0: i32, %arg1: i32) -> (i32, i32) {
    %c0_i32 = arith.constant 0 : i32
    %c0_i32_0 = arith.constant 0 : i32
    %c0_i32_1 = arith.constant 0 : i32
    return %c0_i32, %c0_i32_0 : i32, i32
  }
  func.func @transform_8(%arg0: i32, %arg1: i32) -> (i32, i32) {
    %c0_i32 = arith.constant 0 : i32
    %c0_i32_0 = arith.constant 0 : i32
    %c0_i32_1 = arith.constant 0 : i32
    return %c0_i32, %c0_i32_0 : i32, i32
  }
  func.func @transform_9(%arg0: i32, %arg1: i32) -> (i32, i32, i32) {
    %c0_i32 = arith.constant 0 : i32
    %c0_i32_0 = arith.constant 0 : i32
    %c0_i32_1 = arith.constant 0 : i32
    return %arg0, %c0_i32, %c0_i32_0 : i32, i32, i32
  }
  func.func @transform_10(%arg0: i32, %arg1: i32) -> (i32, i32, i32, i32) {
    %c0_i32 = arith.constant 0 : i32
    %c0_i32_0 = arith.constant 0 : i32
    %c0_i32_1 = arith.constant 0 : i32
    return %arg0, %arg1, %c0_i32, %c0_i32_0 : i32, i32, i32, i32
  }
}

module attributes {stable_mosaic.version = 11 : i64} {
  func.func @_mha_kernel(%arg0: i32, %arg1: i32, %arg2: memref<1x8x32xf32, #tpu.memory_space<vmem>>, %arg3: memref<32x32xf32, #tpu.memory_space<vmem>>, %arg4: memref<1x32xf32, #tpu.memory_space<vmem>>, %arg5: memref<32x32xf32, #tpu.memory_space<vmem>>, %arg6: memref<32x32xf32, #tpu.memory_space<vmem>>, %arg7: memref<1x32xf32, #tpu.memory_space<vmem>>, %arg8: memref<32x32xf32, #tpu.memory_space<vmem>>, %arg9: memref<1x32xf32, #tpu.memory_space<vmem>>, %arg10: memref<8x8xf32, #tpu.memory_space<vmem>>, %arg11: memref<1x8x32xf32, #tpu.memory_space<vmem>>, %arg12: memref<1x1x8x8xf32, #tpu.memory_space<vmem>>, %arg13: memref<4x8x8xf32, #tpu.memory_space<vmem>>, %arg14: memref<4x8x8xf32, #tpu.memory_space<vmem>>, %arg15: memref<4x8x8xf32, #tpu.memory_space<vmem>>, %arg16: memref<4x8x8xf32, #tpu.memory_space<vmem>>) attributes {dimension_semantics = [#tpu.dimension_semantics<parallel>, #tpu.dimension_semantics<arbitrary>], iteration_bounds = array<i64: 2, 4>, scalar_prefetch = 0 : i64, scratch_operands = 4 : i64, tpu.core_type = #tpu.core_type<tc>, window_params = [{transform_indices = @transform_0, window_bounds = array<i64: 1, 8, 32>}, {pipeline_mode = #tpu.pipeline_mode<synchronous>, transform_indices = @transform_1, window_bounds = array<i64: 32, 32>}, {pipeline_mode = #tpu.pipeline_mode<synchronous>, transform_indices = @transform_2, window_bounds = array<i64: 1, 32>}, {pipeline_mode = #tpu.pipeline_mode<synchronous>, transform_indices = @transform_3, window_bounds = array<i64: 32, 32>}, {pipeline_mode = #tpu.pipeline_mode<synchronous>, transform_indices = @transform_4, window_bounds = array<i64: 32, 32>}, {pipeline_mode = #tpu.pipeline_mode<synchronous>, transform_indices = @transform_5, window_bounds = array<i64: 1, 32>}, {pipeline_mode = #tpu.pipeline_mode<synchronous>, transform_indices = @transform_6, window_bounds = array<i64: 32, 32>}, {pipeline_mode = #tpu.pipeline_mode<synchronous>, transform_indices = @transform_7, window_bounds = array<i64: 1, 32>}, {pipeline_mode = #tpu.pipeline_mode<synchronous>, transform_indices = @transform_8, window_bounds = array<i64: 8, 8>}, {transform_indices = @transform_9, window_bounds = array<i64: 1, 8, 32>}, {transform_indices = @transform_10, window_bounds = array<i64: 1, 1, 8, 8>}]} {
    %c0_i32 = arith.constant 0 : i32
    %0 = arith.cmpi eq, %arg1, %c0_i32 : i32
    %1 = arith.extui %0 : i1 to i32
    %c0_i32_0 = arith.constant 0 : i32
    %2 = arith.cmpi ne, %1, %c0_i32_0 : i32
    scf.if %2 {
      %c0_20 = arith.constant 0 : index
      %c0_21 = arith.constant 0 : index
      %c0_22 = arith.constant 0 : index
      %40 = vector.load %arg2[%c0_20, %c0_21, %c0_22] : memref<1x8x32xf32, #tpu.memory_space<vmem>>, vector<1x8x32xf32>
      %41 = vector.shape_cast %40 : vector<1x8x32xf32> to vector<8x32xf32>
      %c0_23 = arith.constant 0 : index
      %c0_24 = arith.constant 0 : index
      %42 = vector.load %arg3[%c0_23, %c0_24] : memref<32x32xf32, #tpu.memory_space<vmem>>, vector<32x32xf32>
      %cst_25 = arith.constant dense<0.000000e+00> : vector<8x32xf32>
      %43 = tpu.matmul %41, %42, %cst_25 {dimension_numbers = #tpu.dot_dimension_numbers<[1], [0], [0], [1], [0, 0, 1, 1], [], []>} : vector<8x32xf32>, vector<32x32xf32>, vector<8x32xf32> -> vector<8x32xf32>
      %c0_26 = arith.constant 0 : index
      %c0_27 = arith.constant 0 : index
      %44 = vector.load %arg4[%c0_26, %c0_27] : memref<1x32xf32, #tpu.memory_space<vmem>>, vector<1x32xf32>
      %45 = vector.broadcast %44 : vector<1x32xf32> to vector<8x32xf32>
      %46 = arith.addf %43, %45 : vector<8x32xf32>
      %c0_28 = arith.constant 0 : index
      %c0_29 = arith.constant 0 : index
      %47 = vector.load %arg5[%c0_28, %c0_29] : memref<32x32xf32, #tpu.memory_space<vmem>>, vector<32x32xf32>
      %cst_30 = arith.constant dense<0.000000e+00> : vector<8x32xf32>
      %48 = tpu.matmul %41, %47, %cst_30 {dimension_numbers = #tpu.dot_dimension_numbers<[1], [0], [0], [1], [0, 0, 1, 1], [], []>} : vector<8x32xf32>, vector<32x32xf32>, vector<8x32xf32> -> vector<8x32xf32>
      %c0_31 = arith.constant 0 : index
      %c0_32 = arith.constant 0 : index
      %49 = vector.load %arg6[%c0_31, %c0_32] : memref<32x32xf32, #tpu.memory_space<vmem>>, vector<32x32xf32>
      %cst_33 = arith.constant dense<0.000000e+00> : vector<8x32xf32>
      %50 = tpu.matmul %41, %49, %cst_33 {dimension_numbers = #tpu.dot_dimension_numbers<[1], [0], [0], [1], [0, 0, 1, 1], [], []>} : vector<8x32xf32>, vector<32x32xf32>, vector<8x32xf32> -> vector<8x32xf32>
      %c0_34 = arith.constant 0 : index
      %c0_35 = arith.constant 0 : index
      %51 = vector.load %arg7[%c0_34, %c0_35] : memref<1x32xf32, #tpu.memory_space<vmem>>, vector<1x32xf32>
      %52 = vector.broadcast %51 : vector<1x32xf32> to vector<8x32xf32>
      %53 = arith.addf %50, %52 : vector<8x32xf32>
      %cst_36 = arith.constant 0.353553385 : f32
      %54 = vector.broadcast %cst_36 : f32 to vector<8x32xf32>
      %55 = arith.mulf %46, %54 : vector<8x32xf32>
      %56 = vector.extract_strided_slice %55 {offsets = [0, 0], sizes = [8, 8], strides = [1, 1]} : vector<8x32xf32> to vector<8x8xf32>
      %c0_37 = arith.constant 0 : index
      %c0_38 = arith.constant 0 : index
      %c0_39 = arith.constant 0 : index
      %57 = vector.load %arg13[%c0_37, %c0_38, %c0_39] : memref<4x8x8xf32, #tpu.memory_space<vmem>>, vector<1x8x8xf32>
      %58 = vector.shape_cast %57 : vector<1x8x8xf32> to vector<8x8xf32>
      %59 = vector.shape_cast %56 : vector<8x8xf32> to vector<1x8x8xf32>
      tpu.vector_store %arg13[%c0_37, %c0_38, %c0_39], %59 {strides = array<i32>} : memref<4x8x8xf32, #tpu.memory_space<vmem>>, vector<1x8x8xf32>,
      %60 = vector.extract_strided_slice %48 {offsets = [0, 0], sizes = [8, 8], strides = [1, 1]} : vector<8x32xf32> to vector<8x8xf32>
      %c0_40 = arith.constant 0 : index
      %c0_41 = arith.constant 0 : index
      %c0_42 = arith.constant 0 : index
      %61 = vector.load %arg14[%c0_40, %c0_41, %c0_42] : memref<4x8x8xf32, #tpu.memory_space<vmem>>, vector<1x8x8xf32>
      %62 = vector.shape_cast %61 : vector<1x8x8xf32> to vector<8x8xf32>
      %63 = vector.shape_cast %60 : vector<8x8xf32> to vector<1x8x8xf32>
      tpu.vector_store %arg14[%c0_40, %c0_41, %c0_42], %63 {strides = array<i32>} : memref<4x8x8xf32, #tpu.memory_space<vmem>>, vector<1x8x8xf32>,
      %64 = vector.extract_strided_slice %53 {offsets = [0, 0], sizes = [8, 8], strides = [1, 1]} : vector<8x32xf32> to vector<8x8xf32>
      %c0_43 = arith.constant 0 : index
      %c0_44 = arith.constant 0 : index
      %c0_45 = arith.constant 0 : index
      %65 = vector.load %arg15[%c0_43, %c0_44, %c0_45] : memref<4x8x8xf32, #tpu.memory_space<vmem>>, vector<1x8x8xf32>
      %66 = vector.shape_cast %65 : vector<1x8x8xf32> to vector<8x8xf32>
      %67 = vector.shape_cast %64 : vector<8x8xf32> to vector<1x8x8xf32>
      tpu.vector_store %arg15[%c0_43, %c0_44, %c0_45], %67 {strides = array<i32>} : memref<4x8x8xf32, #tpu.memory_space<vmem>>, vector<1x8x8xf32>,
      %68 = vector.extract_strided_slice %55 {offsets = [0, 8], sizes = [8, 8], strides = [1, 1]} : vector<8x32xf32> to vector<8x8xf32>
      %c1 = arith.constant 1 : index
      %c0_46 = arith.constant 0 : index
      %c0_47 = arith.constant 0 : index
      %69 = vector.load %arg13[%c1, %c0_46, %c0_47] : memref<4x8x8xf32, #tpu.memory_space<vmem>>, vector<1x8x8xf32>
      %70 = vector.shape_cast %69 : vector<1x8x8xf32> to vector<8x8xf32>
      %71 = vector.shape_cast %68 : vector<8x8xf32> to vector<1x8x8xf32>
      tpu.vector_store %arg13[%c1, %c0_46, %c0_47], %71 {strides = array<i32>} : memref<4x8x8xf32, #tpu.memory_space<vmem>>, vector<1x8x8xf32>,
      %72 = vector.extract_strided_slice %48 {offsets = [0, 8], sizes = [8, 8], strides = [1, 1]} : vector<8x32xf32> to vector<8x8xf32>
      %c1_48 = arith.constant 1 : index
      %c0_49 = arith.constant 0 : index
      %c0_50 = arith.constant 0 : index
      %73 = vector.load %arg14[%c1_48, %c0_49, %c0_50] : memref<4x8x8xf32, #tpu.memory_space<vmem>>, vector<1x8x8xf32>
      %74 = vector.shape_cast %73 : vector<1x8x8xf32> to vector<8x8xf32>
      %75 = vector.shape_cast %72 : vector<8x8xf32> to vector<1x8x8xf32>
      tpu.vector_store %arg14[%c1_48, %c0_49, %c0_50], %75 {strides = array<i32>} : memref<4x8x8xf32, #tpu.memory_space<vmem>>, vector<1x8x8xf32>,
      %76 = vector.extract_strided_slice %53 {offsets = [0, 8], sizes = [8, 8], strides = [1, 1]} : vector<8x32xf32> to vector<8x8xf32>
      %c1_51 = arith.constant 1 : index
      %c0_52 = arith.constant 0 : index
      %c0_53 = arith.constant 0 : index
      %77 = vector.load %arg15[%c1_51, %c0_52, %c0_53] : memref<4x8x8xf32, #tpu.memory_space<vmem>>, vector<1x8x8xf32>
      %78 = vector.shape_cast %77 : vector<1x8x8xf32> to vector<8x8xf32>
      %79 = vector.shape_cast %76 : vector<8x8xf32> to vector<1x8x8xf32>
      tpu.vector_store %arg15[%c1_51, %c0_52, %c0_53], %79 {strides = array<i32>} : memref<4x8x8xf32, #tpu.memory_space<vmem>>, vector<1x8x8xf32>,
      %80 = vector.extract_strided_slice %55 {offsets = [0, 16], sizes = [8, 8], strides = [1, 1]} : vector<8x32xf32> to vector<8x8xf32>
      %c2 = arith.constant 2 : index
      %c0_54 = arith.constant 0 : index
      %c0_55 = arith.constant 0 : index
      %81 = vector.load %arg13[%c2, %c0_54, %c0_55] : memref<4x8x8xf32, #tpu.memory_space<vmem>>, vector<1x8x8xf32>
      %82 = vector.shape_cast %81 : vector<1x8x8xf32> to vector<8x8xf32>
      %83 = vector.shape_cast %80 : vector<8x8xf32> to vector<1x8x8xf32>
      tpu.vector_store %arg13[%c2, %c0_54, %c0_55], %83 {strides = array<i32>} : memref<4x8x8xf32, #tpu.memory_space<vmem>>, vector<1x8x8xf32>,
      %84 = vector.extract_strided_slice %48 {offsets = [0, 16], sizes = [8, 8], strides = [1, 1]} : vector<8x32xf32> to vector<8x8xf32>
      %c2_56 = arith.constant 2 : index
      %c0_57 = arith.constant 0 : index
      %c0_58 = arith.constant 0 : index
      %85 = vector.load %arg14[%c2_56, %c0_57, %c0_58] : memref<4x8x8xf32, #tpu.memory_space<vmem>>, vector<1x8x8xf32>
      %86 = vector.shape_cast %85 : vector<1x8x8xf32> to vector<8x8xf32>
      %87 = vector.shape_cast %84 : vector<8x8xf32> to vector<1x8x8xf32>
      tpu.vector_store %arg14[%c2_56, %c0_57, %c0_58], %87 {strides = array<i32>} : memref<4x8x8xf32, #tpu.memory_space<vmem>>, vector<1x8x8xf32>,
      %88 = vector.extract_strided_slice %53 {offsets = [0, 16], sizes = [8, 8], strides = [1, 1]} : vector<8x32xf32> to vector<8x8xf32>
      %c2_59 = arith.constant 2 : index
      %c0_60 = arith.constant 0 : index
      %c0_61 = arith.constant 0 : index
      %89 = vector.load %arg15[%c2_59, %c0_60, %c0_61] : memref<4x8x8xf32, #tpu.memory_space<vmem>>, vector<1x8x8xf32>
      %90 = vector.shape_cast %89 : vector<1x8x8xf32> to vector<8x8xf32>
      %91 = vector.shape_cast %88 : vector<8x8xf32> to vector<1x8x8xf32>
      tpu.vector_store %arg15[%c2_59, %c0_60, %c0_61], %91 {strides = array<i32>} : memref<4x8x8xf32, #tpu.memory_space<vmem>>, vector<1x8x8xf32>,
      %92 = vector.extract_strided_slice %55 {offsets = [0, 24], sizes = [8, 8], strides = [1, 1]} : vector<8x32xf32> to vector<8x8xf32>
      %c3 = arith.constant 3 : index
      %c0_62 = arith.constant 0 : index
      %c0_63 = arith.constant 0 : index
      %93 = vector.load %arg13[%c3, %c0_62, %c0_63] : memref<4x8x8xf32, #tpu.memory_space<vmem>>, vector<1x8x8xf32>
      %94 = vector.shape_cast %93 : vector<1x8x8xf32> to vector<8x8xf32>
      %95 = vector.shape_cast %92 : vector<8x8xf32> to vector<1x8x8xf32>
      tpu.vector_store %arg13[%c3, %c0_62, %c0_63], %95 {strides = array<i32>} : memref<4x8x8xf32, #tpu.memory_space<vmem>>, vector<1x8x8xf32>,
      %96 = vector.extract_strided_slice %48 {offsets = [0, 24], sizes = [8, 8], strides = [1, 1]} : vector<8x32xf32> to vector<8x8xf32>
      %c3_64 = arith.constant 3 : index
      %c0_65 = arith.constant 0 : index
      %c0_66 = arith.constant 0 : index
      %97 = vector.load %arg14[%c3_64, %c0_65, %c0_66] : memref<4x8x8xf32, #tpu.memory_space<vmem>>, vector<1x8x8xf32>
      %98 = vector.shape_cast %97 : vector<1x8x8xf32> to vector<8x8xf32>
      %99 = vector.shape_cast %96 : vector<8x8xf32> to vector<1x8x8xf32>
      tpu.vector_store %arg14[%c3_64, %c0_65, %c0_66], %99 {strides = array<i32>} : memref<4x8x8xf32, #tpu.memory_space<vmem>>, vector<1x8x8xf32>,
      %100 = vector.extract_strided_slice %53 {offsets = [0, 24], sizes = [8, 8], strides = [1, 1]} : vector<8x32xf32> to vector<8x8xf32>
      %c3_67 = arith.constant 3 : index
      %c0_68 = arith.constant 0 : index
      %c0_69 = arith.constant 0 : index
      %101 = vector.load %arg15[%c3_67, %c0_68, %c0_69] : memref<4x8x8xf32, #tpu.memory_space<vmem>>, vector<1x8x8xf32>
      %102 = vector.shape_cast %101 : vector<1x8x8xf32> to vector<8x8xf32>
      %103 = vector.shape_cast %100 : vector<8x8xf32> to vector<1x8x8xf32>
      tpu.vector_store %arg15[%c3_67, %c0_68, %c0_69], %103 {strides = array<i32>} : memref<4x8x8xf32, #tpu.memory_space<vmem>>, vector<1x8x8xf32>,
    } else {
    }
    %3 = arith.index_cast %arg1 : i32 to index
    %c0 = arith.constant 0 : index
    %c0_1 = arith.constant 0 : index
    %4 = vector.load %arg13[%3, %c0, %c0_1] : memref<4x8x8xf32, #tpu.memory_space<vmem>>, vector<1x8x8xf32>
    %5 = vector.shape_cast %4 : vector<1x8x8xf32> to vector<8x8xf32>
    %6 = arith.index_cast %arg1 : i32 to index
    %c0_2 = arith.constant 0 : index
    %c0_3 = arith.constant 0 : index
    %7 = vector.load %arg14[%6, %c0_2, %c0_3] : memref<4x8x8xf32, #tpu.memory_space<vmem>>, vector<1x8x8xf32>
    %8 = vector.shape_cast %7 : vector<1x8x8xf32> to vector<8x8xf32>
    %9 = arith.index_cast %arg1 : i32 to index
    %c0_4 = arith.constant 0 : index
    %c0_5 = arith.constant 0 : index
    %10 = vector.load %arg15[%9, %c0_4, %c0_5] : memref<4x8x8xf32, #tpu.memory_space<vmem>>, vector<1x8x8xf32>
    %11 = vector.shape_cast %10 : vector<1x8x8xf32> to vector<8x8xf32>
    %cst = arith.constant dense<0.000000e+00> : vector<8x8xf32>
    %12 = tpu.matmul %5, %8, %cst {dimension_numbers = #tpu.dot_dimension_numbers<[1], [1], [0], [0], [0, 0, 1, 0], [], []>} : vector<8x8xf32>, vector<8x8xf32>, vector<8x8xf32> -> vector<8x8xf32>
    %c0_6 = arith.constant 0 : index
    %c0_7 = arith.constant 0 : index
    %13 = vector.load %arg10[%c0_6, %c0_7] : memref<8x8xf32, #tpu.memory_space<vmem>>, vector<8x8xf32>
    %14 = arith.addf %12, %13 : vector<8x8xf32>
    %c0_8 = arith.constant 0 : index
    %c0_9 = arith.constant 0 : index
    %c0_10 = arith.constant 0 : index
    %c0_11 = arith.constant 0 : index
    %15 = vector.load %arg12[%c0_8, %c0_9, %c0_10, %c0_11] : memref<1x1x8x8xf32, #tpu.memory_space<vmem>>, vector<1x1x8x8xf32>
    %16 = vector.shape_cast %15 : vector<1x1x8x8xf32> to vector<8x8xf32>
    %17 = vector.shape_cast %14 : vector<8x8xf32> to vector<1x1x8x8xf32>
    tpu.vector_store %arg12[%c0_8, %c0_9, %c0_10, %c0_11], %17 {strides = array<i32>} : memref<1x1x8x8xf32, #tpu.memory_space<vmem>>, vector<1x1x8x8xf32>,
    %cst_12 = arith.constant dense<0xFF800000> : vector<8xf32>
    %18 = vector.multi_reduction <maximumf>, %14, %cst_12 [1] : vector<8x8xf32> to vector<8xf32>
    %19 = vector.shape_cast %18 : vector<8xf32> to vector<8x1xf32>
    %cst_13 = arith.constant -1.000000e+30 : f32
    %20 = vector.broadcast %cst_13 : f32 to vector<8x1xf32>
    %21 = arith.maximumf %19, %20 : vector<8x1xf32>
    %22 = vector.broadcast %21 : vector<8x1xf32> to vector<8x8xf32>
    %23 = arith.subf %14, %22 : vector<8x8xf32>
    %24 = math.exp %23 : vector<8x8xf32>
    %cst_14 = arith.constant dense<0.000000e+00> : vector<8xf32>
    %25 = vector.multi_reduction <add>, %24, %cst_14 [1] : vector<8x8xf32> to vector<8xf32>
    %26 = vector.shape_cast %25 : vector<8xf32> to vector<8x1xf32>
    %cst_15 = arith.constant 1.000000e-30 : f32
    %27 = vector.broadcast %cst_15 : f32 to vector<8x1xf32>
    %28 = arith.maximumf %26, %27 : vector<8x1xf32>
    %29 = tpu.reciprocal %28 : vector<8x1xf32> -> vector<8x1xf32>
    %30 = vector.broadcast %29 : vector<8x1xf32> to vector<8x8xf32>
    %31 = arith.mulf %24, %30 : vector<8x8xf32>
    %cst_16 = arith.constant dense<0.000000e+00> : vector<8x8xf32>
    %32 = tpu.matmul %31, %11, %cst_16 {dimension_numbers = #tpu.dot_dimension_numbers<[1], [0], [0], [1], [0, 0, 1, 1], [], []>} : vector<8x8xf32>, vector<8x8xf32>, vector<8x8xf32> -> vector<8x8xf32>
    %33 = arith.index_cast %arg1 : i32 to index
    %c0_17 = arith.constant 0 : index
    %c0_18 = arith.constant 0 : index
    %34 = vector.load %arg16[%33, %c0_17, %c0_18] : memref<4x8x8xf32, #tpu.memory_space<vmem>>, vector<1x8x8xf32>
    %35 = vector.shape_cast %34 : vector<1x8x8xf32> to vector<8x8xf32>
    %36 = vector.shape_cast %32 : vector<8x8xf32> to vector<1x8x8xf32>
    tpu.vector_store %arg16[%33, %c0_17, %c0_18], %36 {strides = array<i32>} : memref<4x8x8xf32, #tpu.memory_space<vmem>>, vector<1x8x8xf32>,
    %c3_i32 = arith.constant 3 : i32
    %37 = arith.cmpi eq, %arg1, %c3_i32 : i32
    %38 = arith.extui %37 : i1 to i32
    %c0_i32_19 = arith.constant 0 : i32
    %39 = arith.cmpi ne, %38, %c0_i32_19 : i32
    scf.if %39 {
      %c0_20 = arith.constant 0 : index
      %c0_21 = arith.constant 0 : index
      %c0_22 = arith.constant 0 : index
      %40 = vector.load %arg16[%c0_20, %c0_21, %c0_22] : memref<4x8x8xf32, #tpu.memory_space<vmem>>, vector<1x8x8xf32>
      %41 = vector.shape_cast %40 : vector<1x8x8xf32> to vector<8x8xf32>
      %c1 = arith.constant 1 : index
      %c0_23 = arith.constant 0 : index
      %c0_24 = arith.constant 0 : index
      %42 = vector.load %arg16[%c1, %c0_23, %c0_24] : memref<4x8x8xf32, #tpu.memory_space<vmem>>, vector<1x8x8xf32>
      %43 = vector.shape_cast %42 : vector<1x8x8xf32> to vector<8x8xf32>
      %c2 = arith.constant 2 : index
      %c0_25 = arith.constant 0 : index
      %c0_26 = arith.constant 0 : index
      %44 = vector.load %arg16[%c2, %c0_25, %c0_26] : memref<4x8x8xf32, #tpu.memory_space<vmem>>, vector<1x8x8xf32>
      %45 = vector.shape_cast %44 : vector<1x8x8xf32> to vector<8x8xf32>
      %c3 = arith.constant 3 : index
      %c0_27 = arith.constant 0 : index
      %c0_28 = arith.constant 0 : index
      %46 = vector.load %arg16[%c3, %c0_27, %c0_28] : memref<4x8x8xf32, #tpu.memory_space<vmem>>, vector<1x8x8xf32>
      %47 = vector.shape_cast %46 : vector<1x8x8xf32> to vector<8x8xf32>
      %48 = tpu.concatenate %41, %43, %45, %47 in 1 : vector<8x8xf32>, vector<8x8xf32>, vector<8x8xf32>, vector<8x8xf32> -> vector<8x32xf32>
      %c0_29 = arith.constant 0 : index
      %c0_30 = arith.constant 0 : index
      %49 = vector.load %arg8[%c0_29, %c0_30] : memref<32x32xf32, #tpu.memory_space<vmem>>, vector<32x32xf32>
      %cst_31 = arith.constant dense<0.000000e+00> : vector<8x32xf32>
      %50 = tpu.matmul %48, %49, %cst_31 {dimension_numbers = #tpu.dot_dimension_numbers<[1], [0], [0], [1], [0, 0, 1, 1], [], []>} : vector<8x32xf32>, vector<32x32xf32>, vector<8x32xf32> -> vector<8x32xf32>
      %c0_32 = arith.constant 0 : index
      %c0_33 = arith.constant 0 : index
      %51 = vector.load %arg9[%c0_32, %c0_33] : memref<1x32xf32, #tpu.memory_space<vmem>>, vector<1x32xf32>
      %52 = vector.broadcast %51 : vector<1x32xf32> to vector<8x32xf32>
      %53 = arith.addf %50, %52 : vector<8x32xf32>
      %c0_34 = arith.constant 0 : index
      %c0_35 = arith.constant 0 : index
      %c0_36 = arith.constant 0 : index
      %54 = vector.load %arg11[%c0_34, %c0_35, %c0_36] : memref<1x8x32xf32, #tpu.memory_space<vmem>>, vector<1x8x32xf32>
      %55 = vector.shape_cast %54 : vector<1x8x32xf32> to vector<8x32xf32>
      %56 = vector.shape_cast %53 : vector<8x32xf32> to vector<1x8x32xf32>
      tpu.vector_store %arg11[%c0_34, %c0_35, %c0_36], %56 {strides = array<i32>} : memref<1x8x32xf32, #tpu.memory_space<vmem>>, vector<1x8x32xf32>,
    } else {
    }
    return
  }
  func.func @transform_0(%arg0: i32, %arg1: i32) -> (i32, i32, i32) {
    %c0_i32 = arith.constant 0 : i32
    %c0_i32_0 = arith.constant 0 : i32
    %c0_i32_1 = arith.constant 0 : i32
    return %arg0, %c0_i32, %c0_i32_0 : i32, i32, i32
  }
  func.func @transform_1(%arg0: i32, %arg1: i32) -> (i32, i32) {
    %c0_i32 = arith.constant 0 : i32
    %c0_i32_0 = arith.constant 0 : i32
    %c0_i32_1 = arith.constant 0 : i32
    return %c0_i32, %c0_i32_0 : i32, i32
  }
  func.func @transform_2(%arg0: i32, %arg1: i32) -> (i32, i32) {
    %c0_i32 = arith.constant 0 : i32
    %c0_i32_0 = arith.constant 0 : i32
    %c0_i32_1 = arith.constant 0 : i32
    return %c0_i32, %c0_i32_0 : i32, i32
  }
  func.func @transform_3(%arg0: i32, %arg1: i32) -> (i32, i32) {
    %c0_i32 = arith.constant 0 : i32
    %c0_i32_0 = arith.constant 0 : i32
    %c0_i32_1 = arith.constant 0 : i32
    return %c0_i32, %c0_i32_0 : i32, i32
  }
  func.func @transform_4(%arg0: i32, %arg1: i32) -> (i32, i32) {
    %c0_i32 = arith.constant 0 : i32
    %c0_i32_0 = arith.constant 0 : i32
    %c0_i32_1 = arith.constant 0 : i32
    return %c0_i32, %c0_i32_0 : i32, i32
  }
  func.func @transform_5(%arg0: i32, %arg1: i32) -> (i32, i32) {
    %c0_i32 = arith.constant 0 : i32
    %c0_i32_0 = arith.constant 0 : i32
    %c0_i32_1 = arith.constant 0 : i32
    return %c0_i32, %c0_i32_0 : i32, i32
  }
  func.func @transform_6(%arg0: i32, %arg1: i32) -> (i32, i32) {
    %c0_i32 = arith.constant 0 : i32
    %c0_i32_0 = arith.constant 0 : i32
    %c0_i32_1 = arith.constant 0 : i32
    return %c0_i32, %c0_i32_0 : i32, i32
  }
  func.func @transform_7(%arg0: i32, %arg1: i32) -> (i32, i32) {
    %c0_i32 = arith.constant 0 : i32
    %c0_i32_0 = arith.constant 0 : i32
    %c0_i32_1 = arith.constant 0 : i32
    return %c0_i32, %c0_i32_0 : i32, i32
  }
  func.func @transform_8(%arg0: i32, %arg1: i32) -> (i32, i32) {
    %c0_i32 = arith.constant 0 : i32
    %c0_i32_0 = arith.constant 0 : i32
    %c0_i32_1 = arith.constant 0 : i32
    return %c0_i32, %c0_i32_0 : i32, i32
  }
  func.func @transform_9(%arg0: i32, %arg1: i32) -> (i32, i32, i32) {
    %c0_i32 = arith.constant 0 : i32
    %c0_i32_0 = arith.constant 0 : i32
    %c0_i32_1 = arith.constant 0 : i32
    return %arg0, %c0_i32, %c0_i32_0 : i32, i32, i32
  }
  func.func @transform_10(%arg0: i32, %arg1: i32) -> (i32, i32, i32, i32) {
    %c0_i32 = arith.constant 0 : i32
    %c0_i32_0 = arith.constant 0 : i32
    %c0_i32_1 = arith.constant 0 : i32
    return %arg0, %arg1, %c0_i32, %c0_i32_0 : i32, i32, i32, i32
  }
}

</mosaic_0001>

<bundles_post_ra>
// kernel: tpu_custom_call.1
= control target key start
LH: loop header
LB: loop body
LE: loop exit
PB: predicated region body
PF: predicated region fallthrough
CT: control target
= control target key end

     0   :  { %s2397_s0 = inlined_call_operand.hbm [shape: f32[2,8,32], index: 0, kind: input, shape index: {}]   ;;  %s2398_s1 = inlined_call_operand.hbm [shape: f32[32,32], index: 1, kind: input, shape index: {}]   ;;  %s2399_s2 = inlined_call_operand.vmem [shape: f32[1,32], index: 2, kind: input, shape index: {}]   ;;  %s2400_s3 = inlined_call_operand.hbm [shape: f32[32,32], index: 3, kind: input, shape index: {}]   ;;  %s2401_s4 = inlined_call_operand.hbm [shape: f32[32,32], index: 4, kind: input, shape index: {}]   ;;  %s2402_s5 = inlined_call_operand.vmem [shape: f32[1,32], index: 5, kind: input, shape index: {}]   ;;  %s2403_s6 = inlined_call_operand.hbm [shape: f32[32,32], index: 6, kind: input, shape index: {}]   ;;  %s2404_s7 = inlined_call_operand.vmem [shape: f32[1,32], index: 7, kind: input, shape index: {}]   ;;  %s2405_s8 = inlined_call_operand.vmem [shape: f32[8,8], index: 8, kind: input, shape index: {}]   ;;  %s2406_s9 = inlined_call_operand.hbm [shape: f32[2,8,32], index: 9, kind: output, shape index: {0}]   ;;  %s2407_s10 = inlined_call_operand.hbm [shape: f32[2,4,8,8], index: 10, kind: output, shape index: {1}]  }
   0x1   :  { %2425 = sst [smem:[#allocation29_spill]] %s2397_s0 }
   0x2   :  { %2426 = sst [smem:[#allocation30_spill]] %s2398_s1 }
   0x3   :  { %2427 = sst [smem:[#allocation31_spill]] %s2399_s2 }
   0x4   :  { %2428 = sst [smem:[#allocation32_spill]] %s2400_s3 }
   0x5   :  { %2429 = sst [smem:[#allocation33_spill]] %s2401_s4 }
   0x6   :  { %2430 = sst [smem:[#allocation34_spill]] %s2402_s5 }
   0x7   :  { %2431 = sst [smem:[#allocation35_spill]] %s2403_s6 }
   0x8   :  { %2432 = sst [smem:[#allocation36_spill]] %s2404_s7 }
   0x9   :  { %2433 = sst [smem:[#allocation37_spill]] %s2405_s8 }
   0xa   :  { %2434 = sst [smem:[#allocation38_spill]] %s2406_s9 }
   0xb   :  { %2435 = sst [smem:[#allocation39_spill]] %s2407_s10 }
   0xc   :  { %16 = vsyncpa [#allocation7], 0 }
   0xd   :  { %18 = vsyncpa [#allocation7 + $0x1], 0 }
   0xe   :  { %19 = vsyncpa [#allocation10], 0 }
   0xf   :  { %20 = vsyncpa [#allocation13], 0 }
  0x10   :  { %21 = vsyncpa [#allocation8], 0 }
  0x11   :  { %23 = vsyncpa [#allocation8 + $0x1], 0 }
  0x12   :  { %24 = vsyncpa [#allocation17], 0 }
  0x13   :  { %26 = vsyncpa [#allocation17 + $0x1], 0  ;;  %s1931_s13 = smov 0   ;;  %s1933_s14 = smov 0  }
  0x14   :  { %s1935_s15 = smov 0   ;;  %s1937_s16 = smov 0  }
  0x15   :  { %s1939_s17 = smov 0   ;;  %s1941_s18 = smov 0  }
  0x16   :  { %s1943_s19 = smov 0   ;;  %s1945_s20 = smov 0  }
  0x17   :  { %s1947_s21 = smov 0   ;;  %s1949_s22 = smov 0  }
  0x18   :  { %s1951_s23 = smov 0  }
  0x19 LB: > { %2436 = sst [smem:[#allocation23_spill]] %s1835_s19  ;;  %s2408_s24 = sadd.s32 4294967295, %s1851_s23   ;;  %s1851_s23 = sphi %s1951_s23, %s32_s23   ;;  %s1847_s22 = sphi %s1949_s22, %s2483_s22   ;;  %s1843_s21 = sphi %s1947_s21, %s2491_s21   ;;  %s1839_s20 = sphi %s1945_s20, %s2481_s20   ;;  %s1835_s19 = sphi %s1943_s19, %s2490_s19   ;;  %s1831_s18 = sphi %s1941_s18, %s2489_s18   ;;  %s1827_s17 = sphi %s1939_s17, %s2488_s17   ;;  %s1823_s16 = sphi %s1937_s16, %s2487_s16   ;;  %s1819_s15 = sphi %s1935_s15, %s2486_s15   ;;  %s1815_s14 = sphi %s1933_s14, %s2485_s14   ;;  %s1811_s13 = sphi %s1931_s13, %s2484_s13  }
  0x1a   : > { %2437 = sst [smem:[#allocation24_spill]] %s1839_s20  ;;  %p1241_p0 = scmp.ge.s32.totalorder %s1851_s23, 1 }
  0x1b   : > { %2438 = sst [smem:[#allocation25_spill]] %s1847_s22  ;;  %p1990_p1 = scmp.eq.s32.totalorder %s2408_s24, 0 }
  0x1c   : > { %p297_p2 = scmp.lt.s32.totalorder %s1851_s23, 9  ;;  %s1853_s27 = smov [#allocation9]  }
  0x1d   : > { %s2439_s25 = scalar_select %p1990_p1, 1, 0 }
  0x1e   : > { %p1995_p3 = pnand %p1241_p0, %p297_p2  ;;  %s309_s28 = sshll.u32 %s1853_s27, 4  ;;  %s1999_s28 = int_to_ptr.vmem [resolvable:$true] %s309_s28 }
  0x1f   : > { %s1854_s30 = smov [#allocation12]   ;;  %s1855_s12 = smov [#allocation11]  }
  0x20   : > { %s2440_s26 = scalar_select %p1995_p3, 1, 0 }
  0x21   : > { %p1401_p4 = pneg %p1995_p3  ;;  %s338_s11 = sshll.u32 %s1854_s30, 4  ;;  %s2009_s11 = int_to_ptr.vmem [resolvable:$true] %s338_s11 }
  0x22   : > { %2441 = sst [smem:[#allocation26_spill]] %s2440_s26  ;;  %s2011_s24 = sshll.u32 %s1855_s12, 4  ;;  %s326_s24 = int_to_ptr.vmem [resolvable:$true] %s2011_s24 }
  0x23   : > { %p2005_p5 = pnand %p1401_p4, %p1990_p1  ;;  %s2443_s1 = sld [smem:[#allocation30_spill]] }
  0x25   : > { %p2021_p7 = pneg %p2005_p5 }
  0x29   : > { %s1547_s27 = scalar_lea.hbm %s2443_s1, 512 }
  0x2a   : > { %p1548_p6 = scmp.ne.s32.totalorder %s2443_s1, %s1547_s27  ;;  %p1554_p10 = scmp.lt.u32.totalorder %s1547_s27, %s2443_s1 }
  0x2c   : > { %p1550_p8 = pnand %p2021_p7, %p1548_p6 }
  0x2e   : > { %p1551_p9 = pneg %p1550_p8 }
  0x30   : > { %p1556_p11 = pnand %p1554_p10, %p1551_p9 }
  0x32   : > { %1559 = shalt.err (!%p1556_p11)
}
  0x33   : > { %s1560_s7 = scalar_lea.vmem %s1999_s28, 512  ;;  %p1568_p2 = scmp.lt.s32.totalorder %s1999_s28, %s1999_s28 }
  0x34   : > { %p1561_p12 = scmp.ne.s32.totalorder %s1999_s28, %s1560_s7  ;;  %p1569_p4 = scmp.lt.s32.totalorder %s1560_s7, %s1560_s7 }
  0x36   : > { %p1563_p13 = pnand %p1561_p12, %p2021_p7  ;;  %p1570_p6 = por %p1569_p4, %p1568_p2 }
  0x38   : > { %p1564_p0 = pneg %p1563_p13 }
  0x3a   : > { %p1571_p8 = pnand %p1570_p6, %p1564_p0 }
  0x3c   : > { %1574 = shalt.err (!%p1571_p8)
}
  0x3d   : > { %s1856_s9 = smov 128   ;;  %s1857_s10 = smov 8  }
  0x3e   : > { %1404 = dma.hbm_to_vmem [thread:$0]  (!%p2005_p5), %s2443_s1, 512, %s1999_s28, [#allocation10], %s1856_s9, %s1856_s9, %s1857_s10  }
  0x3f   : > { %s2445_s4 = sld [smem:[#allocation33_spill]] }
  0x45   : > { %s1575_s7 = scalar_lea.hbm %s2445_s4, 512 }
  0x46   : > { %p1576_p9 = scmp.ne.s32.totalorder %s2445_s4, %s1575_s7  ;;  %p1582_p12 = scmp.lt.u32.totalorder %s1575_s7, %s2445_s4 }
  0x48   : > { %p1578_p10 = pnand %p1576_p9, %p2021_p7 }
  0x4a   : > { %p1579_p11 = pneg %p1578_p10 }
  0x4c   : > { %p1584_p13 = pnand %p1582_p12, %p1579_p11 }
  0x4e   : > { %1587 = shalt.err (!%p1584_p13)
}
  0x4f   : > { %s1588_s28 = scalar_lea.vmem %s2009_s11, 512  ;;  %p1596_p6 = scmp.lt.s32.totalorder %s2009_s11, %s2009_s11 }
  0x50   : > { %p1589_p0 = scmp.ne.s32.totalorder %s2009_s11, %s1588_s28  ;;  %p1597_p8 = scmp.lt.s32.totalorder %s1588_s28, %s1588_s28 }
  0x52   : > { %p1591_p2 = pnand %p1589_p0, %p2021_p7  ;;  %p1598_p9 = por %p1597_p8, %p1596_p6 }
  0x54   : > { %p1592_p4 = pneg %p1591_p2 }
  0x56   : > { %p1599_p10 = pnand %p1598_p9, %p1592_p4 }
  0x58   : > { %1602 = shalt.err (!%p1599_p10)
}
  0x59   : > { %1410 = dma.hbm_to_vmem [thread:$0]  (!%p2005_p5), %s2445_s4, 512, %s2009_s11, [#allocation13], %s1856_s9, %s1856_s9, %s1857_s10  }
  0x5a   : > { %s2446_s3 = sld [smem:[#allocation32_spill]] }
  0x60   : > { %s1603_s20 = scalar_lea.hbm %s2446_s3, 512 }
  0x61   : > { %p1604_p11 = scmp.ne.s32.totalorder %s2446_s3, %s1603_s20  ;;  %p1610_p0 = scmp.lt.u32.totalorder %s1603_s20, %s2446_s3 }
  0x63   : > { %p1606_p12 = pnand %p1604_p11, %p2021_p7 }
  0x65   : > { %p1607_p13 = pneg %p1606_p12 }
  0x67   : > { %p1612_p2 = pnand %p1610_p0, %p1607_p13 }
  0x69   : > { %1615 = shalt.err (!%p1612_p2)
}
  0x6a   : > { %s1616_s28 = scalar_lea.vmem %s326_s24, 512  ;;  %p1624_p9 = scmp.lt.s32.totalorder %s326_s24, %s326_s24 }
  0x6b   : > { %p1617_p4 = scmp.ne.s32.totalorder %s326_s24, %s1616_s28  ;;  %p1625_p10 = scmp.lt.s32.totalorder %s1616_s28, %s1616_s28 }
  0x6d   : > { %p1619_p6 = pnand %p1617_p4, %p2021_p7  ;;  %p1626_p3 = por %p1625_p10, %p1624_p9 }
  0x6f   : > { %p1620_p8 = pneg %p1619_p6 }
  0x71   : > { %p1627_p1 = pnand %p1626_p3, %p1620_p8 }
  0x73   : > { %1630 = shalt.err (!%p1627_p1)
}
  0x74   : > { %1407 = dma.hbm_to_vmem [thread:$0]  (!%p2005_p5), %s2446_s3, 512, %s326_s24, [#allocation10], %s1856_s9, %s1856_s9, %s1857_s10  }
  0x75   : > { %s1858_s5 = smov [#allocation14]   ;;  %s2447_s6 = sld [smem:[#allocation35_spill]] }
  0x76   : > { %s354_s19 = sshll.u32 %s1858_s5, 4  ;;  %s355_s19 = int_to_ptr.vmem [resolvable:$true] %s354_s19 }
  0x7b   : > { %s1631_s27 = scalar_lea.hbm %s2447_s6, 512 }
  0x7c   : > { %p1632_p1 = scmp.ne.s32.totalorder %s2447_s6, %s1631_s27  ;;  %p1638_p12 = scmp.lt.u32.totalorder %s1631_s27, %s2447_s6 }
  0x7e   : > { %p1634_p3 = pnand %p1632_p1, %p2021_p7 }
  0x80   : > { %p1635_p11 = pneg %p1634_p3 }
  0x82   : > { %p1640_p13 = pnand %p1638_p12, %p1635_p11 }
  0x84   : > { %1643 = shalt.err (!%p1640_p13)
}
  0x85   : > { %s1644_s24 = scalar_lea.vmem %s355_s19, 512  ;;  %p1652_p6 = scmp.lt.s32.totalorder %s355_s19, %s355_s19 }
  0x86   : > { %p1645_p0 = scmp.ne.s32.totalorder %s355_s19, %s1644_s24  ;;  %p1653_p8 = scmp.lt.s32.totalorder %s1644_s24, %s1644_s24 }
  0x88   : > { %p1647_p2 = pnand %p1645_p0, %p2021_p7  ;;  %p1654_p9 = por %p1653_p8, %p1652_p6 }
  0x8a   : > { %p1648_p4 = pneg %p1647_p2 }
  0x8c   : > { %p1655_p10 = pnand %p1654_p9, %p1648_p4 }
  0x8e   : > { %1658 = shalt.err (!%p1655_p10)
}
  0x8f   : > { %1413 = dma.hbm_to_vmem [thread:$0]  (!%p2005_p5), %s2447_s6, 512, %s355_s19, [#allocation13], %s1856_s9, %s1856_s9, %s1857_s10  }
  0x90   : > { %s1240_s8 = sadd.s32 4294967294, %s1851_s23   ;;  %s41_s29 = sadd.s32 1, %s1843_s21 }
  0x91   : > { %p42_p7 = scmp.ge.s32.totalorder %s41_s29, 4  ;;  %s44_s5 = sadd.s32 1, %s1847_s22 }
  0x92   : > { %s51_s26 = sadd.s32 1, %s1831_s18  ;;  %p58_p1 = scmp.ne.s32.totalorder %s1831_s18, %s1827_s17 }
  0x93   : > { %s2493_s29 = smov (%p42_p7, %s41_s29), 0  ;;  %s2495_s5 = smov (!%p42_p7, %s44_s5), %s1847_s22 }
  0x94   : > { %2448 = sst [smem:[#allocation27_spill]] %s2493_s29  ;;  %p59_p3 = scmp.eq.s32.totalorder %s1851_s23, 0 }
  0x95   : > { %p64_p11 = scmp.ne.s32.totalorder %s1827_s17, %s1823_s16  ;;  %p46_p12 = scmp.ge.s32.totalorder %s2495_s5, 2 }
  0x96   : > { %s2449_s9 = sadd.s32 4294967295, %s1851_s23   ;;  %p2132_p13 = por %p59_p3, %p58_p1 }
  0x97   : > { %p2128_p5 = scmp.eq.s32.totalorder %s2449_s9, 7  ;;  %p2452_p0 = scmp.ne.s32.totalorder %s2439_s25, 0 }
  0x98   : > { %s2497_s5 = smov (%p46_p12, %s2495_s5), 0  ;;  %p2150_p6 = scmp.eq.s32.totalorder %s1240_s8, 7 }
  0x99   : > { %p2138_p2 = por %p2452_p0, %p64_p11  ;;  %2454 = sst [smem:[#allocation28_spill]] %s2497_s5 }
  0x9a   : > { %p2146_p4 = por %p2128_p5, %p58_p1  ;;  %s48_s12 = ssub.s32 %s1847_s22, %s2497_s5 }
  0x9b   : > { %s269_s7 = ssub.s32 %s1843_s21, %s2493_s29  ;;  %p49_p8 = scmp.eq.s32.totalorder %s48_s12, 0 }
  0x9c   : > { %s2455_s27 = scalar_select %p2146_p4, 1, 0 }
  0x9d   : > { %p2160_p9 = por %p2150_p6, %p64_p11  ;;  %s270_s24 = sor.u32 %s269_s7, %s48_s12 }
  0x9e   : > { %s273_s11 = sadd.s32 1, %s1819_s15  ;;  %p271_p10 = scmp.eq.s32.totalorder %s270_s24, 0 }
  0x9f   : > { %s2457_s28 = scalar_select %p2160_p9, 1, 0 }
  0xa0   : > { %s2166_s2 = scalar_select %p49_p8, %s1831_s18, %s51_s26  }
  0xa1   : > { %p283_p7 = scmp.ne.s32.totalorder %s1819_s15, %s1815_s14  ;;  %p289_p1 = scmp.ne.s32.totalorder %s1815_s14, %s1811_s13 }
  0xa2   : > { %p1429_p3 = scmp.lt.s32.totalorder %s1851_s23, 8  ;;  %s374_s12 = sand.u32 1, %s1831_s18  }
  0xa3   : > { %s2174_s8 = scalar_select %p271_p10, %s1819_s15, %s273_s11  }
  0xa4   : > { %p2178_p12 = por %p283_p7, %p2128_p5  ;;  %p2184_p11 = por %p289_p1, %p2150_p6 }
  0xa5   : > { %s1248_s7 = sshll.u32 %s1847_s22, 7  ;;  %s1247_s26 = sshll.u32 %s374_s12, 3 }
  0xa6   : > { %s2458_s9 = scalar_select %p2178_p12, 1, 0 }
  0xa7   : > { %s2459_s1 = scalar_select %p2184_p11, 1, 0 }
  0xa8   : > { %s2460_s0 = sld [smem:[#allocation29_spill]]  ;;  %s378_s10 = scalar_lea.vmem [#allocation6], %s1247_s26 }
  0xa9   : > { %s385_s11 = sshll.u32 %s378_s10, 4  ;;  %p2197_p5 = pnand %p1429_p3, %p2132_p13  ;;  %s2201_s11 = int_to_ptr.vmem [resolvable:$true] %s385_s11 }
  0xaa   : > { %s375_s6 = scalar_lea.sflag [#allocation7], %s374_s12 }
  0xab   : > { %p1661_p6 = pneg %p2197_p5 }
  0xae   : > { %s2193_s4 = scalar_lea.hbm %s2460_s0, %s1248_s7  ;;  %s1664_s19 = scalar_lea.hbm %s2460_s0, 256 }
  0xaf   : > { %s1659_s5 = scalar_lea.hbm %s2193_s4, 128  ;;  %p1665_p13 = scmp.lt.u32.totalorder %s2193_s4, %s2460_s0 }
  0xb0   : > { %p1660_p0 = scmp.ne.s32.totalorder %s2193_s4, %s1659_s5  ;;  %p1666_p7 = scmp.lt.u32.totalorder %s1664_s19, %s1659_s5 }
  0xb1   : > { %p1668_p3 = scmp.lt.u32.totalorder %s1659_s5, %s2193_s4 }
  0xb2   : > { %p1662_p8 = pnand %p1661_p6, %p1660_p0  ;;  %p1667_p1 = por %p1666_p7, %p1665_p13 }
  0xb4   : > { %p1663_p10 = pneg %p1662_p8  ;;  %p1669_p11 = por %p1668_p3, %p1667_p1 }
  0xb6   : > { %p1670_p9 = pnand %p1669_p11, %p1663_p10 }
  0xb8   : > { %1673 = shalt.err (!%p1670_p9)
}
  0xb9   : > { %s1674_s12 = scalar_lea.vmem %s2201_s11, 128  ;;  %s1859_s10 = smov [#allocation6]  }
  0xba   : > { %p1675_p0 = scmp.ne.s32.totalorder %s2201_s11, %s1674_s12  ;;  %s1679_s3 = sshll.u32 %s1859_s10, 4  ;;  %s1680_s3 = int_to_ptr.vmem [resolvable:$false] %s1679_s3 }
  0xbb   : > { %s1681_s7 = scalar_lea.vmem %s1680_s3, 256  ;;  %p1682_p4 = scmp.lt.s32.totalorder %s2201_s11, %s1680_s3 }
  0xbc   : > { %p1677_p8 = pnand %p1675_p0, %p1661_p6  ;;  %p1683_p13 = scmp.lt.s32.totalorder %s1681_s7, %s1674_s12 }
  0xbe   : > { %p1678_p12 = pneg %p1677_p8  ;;  %p1684_p7 = por %p1683_p13, %p1682_p4 }
  0xc0   : > { %p1685_p1 = pnand %p1684_p7, %p1678_p12 }
  0xc2   : > { %1688 = shalt.err (!%p1685_p1)
}
  0xc3   : > { %1417 = dma.hbm_to_vmem [thread:$0]  (!%p2197_p5), %s2193_s4, 128, %s2201_s11, %s375_s6  }
  0xc4   : > { %s2462_s5 = sld [smem:[#allocation26_spill]] }
  0xca   : > { %p2463_p9 = scmp.ne.s32.totalorder %s2462_s5, 0 }
  0xcb   : > { %s2231_s19 = sand.u32 (!%p2463_p9), 1, %s1827_s17  }
  0xcc   : > { %394 = sbr.rel (%p2463_p9) target bundleno = 1736 (0x6c8), region = 56  ;;  %s1250_s26 = sshll.u32 (!%p2463_p9), %s2231_s19, 3 }
  0xcd   : > { %s397_s24 = scalar_lea.sflag (!%p2463_p9), [#allocation7], %s2231_s19  ;;  %s2235_s12 = scalar_lea.vmem (!%p2463_p9), [#allocation6], %s1250_s26 }
  0xd3   : > { %1790 = dma.done.wait (%p2138_p2), %s397_s24, 128  }
  0xd4   : > { %1792 = vsyncadd (%p2138_p2), %s397_s24, 4294967168  ;;  %p2464_p4 = scmp.ne.s32.totalorder %s2439_s25, 0 }
  0xd6   : > { %1794 = dma.done.wait (%p2464_p4), [#allocation10], 1024  }
  0xd7   : > { %1796 = vsyncadd (%p2464_p4), [#allocation10], 4294966272 }
  0xd8   : > { %1798 = dma.done.wait (%p2464_p4), [#allocation13], 1024  }
  0xd9   : > { %1800 = vsyncadd (%p2464_p4), [#allocation13], 4294966272  ;;  %s2420_s4 = sand.u32 1, %s1815_s14   ;;  %s2254_s20 = scalar_lea.vmem [#allocation15], %s1250_s26 }
  0xda   : > { %s2252_s6 = sshll.u32 %s2420_s4, 3  ;;  %s2465_s30 = sld [smem:[#allocation23_spill]] }
  0xdb   : > { %s2421_s11 = scalar_lea.vmem [#allocation16], %s2252_s6 }
  0xe0   : > { %p1257_p2 = scmp.ne.s32.totalorder %s2465_s30, 0 }
  0xe1   : > { %v463_v0 = vld [vmem:[#allocation9] sm:$0xff] (!%p1257_p2)  ;;  %v464_v1 = vld [vmem:[#allocation9 + $0x8] sm:$0xff] (!%p1257_p2)  ;;  %v1860_v3 = vmov (!%p1257_p2), 0.0|0.0   ;;  %v465_v6 = vld [vmem:[#allocation9 + $0x10] sm:$0xff] (!%p1257_p2)  ;;  %vm1861_vm0 = vmmov (!%p1257_p2), 0   ;;  %v1862_v11 = vmov (!%p1257_p2), 0.0  }
  0xe2   : > { %461 = sbr.rel (%p1257_p2) target bundleno = 581 (0x245), region = 80  ;;  %v548_v2 = vld [vmem:[#allocation11] sm:$0xff] (!%p1257_p2)  ;;  %1355 = vmatprep.subr.bf16.mxu0 (!%p1257_p2), %v1860_v3  ;;  %1361 = vmatprep.subr.bf16.mxu1 (!%p1257_p2), %v1860_v3  ;;  %v1356_v4 = vpack.c.bf16 (!%p1257_p2), %v464_v1, %v463_v0  ;;  %v549_v5 = vld [vmem:[#allocation11 + $0x8] sm:$0xff] (!%p1257_p2)  ;;  %v466_v7 = vld [vmem:[#allocation9 + $0x18] sm:$0xff] (!%p1257_p2)  ;;  %vm474_vm1 = vcmask (!%p1257_p2), 261120   ;;  %s2466_s3 = sld [smem:[#allocation31_spill]] (!%p1257_p2) }
  0xe3   : > { %v1362_v8 = vpack.c.bf16 (!%p1257_p2), %v549_v5, %v548_v2  ;;  %v550_v9 = vld [vmem:[#allocation11 + $0x10] sm:$0xff] (!%p1257_p2)  ;;  %v551_v10 = vld [vmem:[#allocation11 + $0x18] sm:$0xff] (!%p1257_p2)  ;;  %1309 = vmatprep.mubr.msk.f32.mxu0 (!%p1257_p2), %vm1861_vm0, %v1862_v11  ;;  %1320 = vmatprep.mubr.msk.f32.mxu1 (!%p1257_p2), %vm1861_vm0, %v1862_v11  ;;  %v1359_v12 = vpack.c.bf16 (!%p1257_p2), %v466_v7, %v465_v6  ;;  %v622_v14 = vld [vmem:[#allocation12] sm:$0xff] (!%p1257_p2)  ;;  %vm704_vm2 = vcmask (!%p1257_p2), 64512   ;;  %s1863_s7 = smov (!%p1257_p2), 120   ;;  %s1864_s5 = smov (!%p1257_p2), 112  }
  0xe4   : > { %1357 = vmatpush3.bf16.msra.mxu0 (!%p1257_p2), %v1356_v4  ;;  %v1365_v13 = vpack.c.bf16 (!%p1257_p2), %v551_v10, %v550_v9  ;;  %v623_v15 = vld [vmem:[#allocation12 + $0x8] sm:$0xff] (!%p1257_p2)  ;;  %v462_v16 = vld [vmem:[%s2235_s12] sm:$0xff] (!%p1257_p2)  ;;  %s2467_s12 = sld [smem:[#allocation34_spill]] (!%p1257_p2)  ;;  %s1865_s30 = smov (!%p1257_p2), 104  }
  0xe5   : > { %1363 = vmatpush3.bf16.msra.mxu1 (!%p1257_p2), %v1362_v8  ;;  %1358 = vmatprep.subr.bf16.mxu0 (!%p1257_p2), %v1860_v3  ;;  %v1368_v17 = vpack.c.bf16 (!%p1257_p2), %v623_v15, %v622_v14  ;;  %v624_v18 = vld [vmem:[#allocation12 + $0x10] sm:$0xff] (!%p1257_p2)  ;;  %v625_v19 = vld [vmem:[#allocation12 + $0x18] sm:$0xff] (!%p1257_p2) }
  0xe6   : > { %1364 = vmatprep.subr.bf16.mxu1 (!%p1257_p2), %v1860_v3  ;;  %v1371_v20 = vpack.c.bf16 (!%p1257_p2), %v625_v19, %v624_v18 }
  0xe8   : > { %1360 = vmatpush3.bf16.msra.mxu0 (!%p1257_p2), %v1359_v12  ;;  %v1258_v21 = vld [vmem:[%s2466_s3] ss:$0 sm:$0xff] (!%p1257_p2) }
  0xe9   : > { %1366 = vmatpush3.bf16.msra.mxu1 %v1365_v13  ;;  %1367 = vmatprep.subr.bf16.mxu0 %v1860_v3 }
  0xea   : > { %v1261_v28 = vld [vmem:[%s2467_s12] ss:$0 sm:$0xff] }
  0xeb   : > { %1310 = vmatmul.mubr.msk.f32.vlgmr.msra.gmra.mrb[0].mxu0 %vm474_vm1, %v462_v16 }
  0xec   : > { %1321 = vmatmul.mubr.msk.f32.vlgmr.msra.gmra.mrb[0].mxu1 %vm474_vm1, %v462_v16  ;;  %1369 = vmatpush3.bf16.msra.mxu0 %v1368_v17 }
  0xed   : > { %1370 = vmatprep.subr.bf16.mxu0 %v1860_v3  ;;  %1331 = vmatprep.mubr.msk.f32.mxu0 %vm1861_vm0, %v1862_v11 }
  0xf0   : > { %1372 = vmatpush3.bf16.msra.mxu0 %v1371_v20 }
  0xf3   : > { %1332 = vmatmul.mubr.msk.f32.vlgmr.msra.gmra.mrb[2].mxu0 %vm474_vm1, %v462_v16 }
 0x1be   : > { %v544_v22 = vpop.f32.mrb[0].mxu0 }
 0x1bf   : > { %v545_v23 = vadd.f32 %v1258_v21, %v544_v22  ;;  %v618_v24 = vpop.f32.mrb[0].mxu1  ;;  %v1311_v25 = vpop.f32.mrb[1].mxu0 }
 0x1c0   : > { %706 = vst.msk [vmem:[#allocation3] sm:$0xff] %vm704_vm2, %v618_v24  ;;  %715 = vrot.lane.b32.xlu0 %v618_v24, %s1863_s7  ;;  %v1322_v26 = vpop.f32.mrb[1].mxu1 }
 0x1c1   : > { %v703_v27 = vmul.f32 0.35355338, %v545_v23 }
 0x1c3   : > { %705 = vst.msk [vmem:[#allocation2] sm:$0xff] %vm704_vm2, %v703_v27  ;;  %726 = vrot.lane.b32.xlu1 %v703_v27, %s1864_s5 }
 0x1c4   : > { %731 = vrot.lane.b32.xlu0 %v618_v24, %s1864_s5 }
 0x1c6   : > { %v699_v29 = vpop.f32.mrb[2].mxu0 }
 0x1c7   : > { %v700_v30 = vadd.f32 %v1261_v28, %v699_v29  ;;  %v1333_v31 = vpop.f32.mrb[3].mxu0 }
 0x1c8   : > { %709 = vrot.lane.b32.xlu0 %v703_v27, %s1863_s7 }
 0x1c9   : > { %707 = vst.msk [vmem:[#allocation4] sm:$0xff] %vm704_vm2, %v700_v30  ;;  %721 = vrot.lane.b32.xlu1 %v700_v30, %s1863_s7 }
 0x1cc   : > { %741 = vrot.lane.b32.xlu0 %v703_v27, %s1865_s30 }
 0x1cd   : > { %736 = vrot.lane.b32.xlu1 %v700_v30, %s1864_s5 }
 0x1d0   : > { %751 = vrot.lane.b32.xlu0 %v700_v30, %s1865_s30 }
 0x1d1   : > { %746 = vrot.lane.b32.xlu1 %v618_v24, %s1865_s30 }
 0x232   : > { %v716_v32 = vpop.permute.xlu0 %715 }
 0x233   : > { %719 = vst.msk [vmem:[#allocation3 + $0x8] sm:$0xff] %vm704_vm2, %v716_v32 }
 0x235   : > { %v727_v33 = vpop.permute.xlu1 %726 }
 0x236   : > { %v732_v34 = vpop.permute.xlu0 %731  ;;  %730 = vst.msk [vmem:[#allocation2 + $0x10] sm:$0xff] %vm704_vm2, %v727_v33 }
 0x237   : > { %735 = vst.msk [vmem:[#allocation3 + $0x10] sm:$0xff] %vm704_vm2, %v732_v34 }
 0x23a   : > { %v710_v35 = vpop.permute.xlu0 %709 }
 0x23b   : > { %713 = vst.msk [vmem:[#allocation2 + $0x8] sm:$0xff] %vm704_vm2, %v710_v35  ;;  %v722_v36 = vpop.permute.xlu1 %721 }
 0x23c   : > { %725 = vst.msk [vmem:[#allocation4 + $0x8] sm:$0xff] %vm704_vm2, %v722_v36 }
 0x23e   : > { %v742_v37 = vpop.permute.xlu0 %741 }
 0x23f   : > { %745 = vst.msk [vmem:[#allocation2 + $0x18] sm:$0xff] %vm704_vm2, %v742_v37  ;;  %v737_v38 = vpop.permute.xlu1 %736 }
 0x240   : > { %740 = vst.msk [vmem:[#allocation4 + $0x10] sm:$0xff] %vm704_vm2, %v737_v38 }
 0x242   : > { %v752_v39 = vpop.permute.xlu0 %751 }
 0x243   : > { %755 = vst.msk [vmem:[#allocation4 + $0x18] sm:$0xff] %vm704_vm2, %v752_v39  ;;  %v747_v40 = vpop.permute.xlu1 %746 }
 0x244   : > { %750 = vst.msk [vmem:[#allocation3 + $0x18] sm:$0xff] %vm704_vm2, %v747_v40 }
 0x245 PF: > { %s2468_s25 = sld [smem:[#allocation23_spill]]  ;;  %vm764_vm3 = vcmask 64512   ;;  %v1866_v41 = vmov 0.0   ;;  %vm1867_vm4 = vmmov 0   ;;  %s2469_s24 = sld [smem:[#allocation37_spill]] }
 0x246   : > { %1334 = vmatprep.subr.mxu0 %v1866_v41  ;;  %1336 = vmatprep.mubr.msk.f32.mxu0 %vm1867_vm4, %v1866_v41 }
 0x247   : > { %1339 = vmatprep.subr.mxu1 %v1866_v41  ;;  %1341 = vmatprep.mubr.msk.f32.mxu1 %vm1867_vm4, %v1866_v41 }
 0x24b   : > { %s2281_s10 = sshll.u32 %s2468_s25, 3  ;;  %v763_v44 = vld [vmem:[%s2469_s24] sm:$0xff]  ;;  %p1267_p12 = scmp.ne.s32.totalorder %s2468_s25, 3 }
 0x24c   : > { %s759_s3 = scalar_lea.vmem [#allocation3], %s2281_s10  ;;  %s757_s7 = scalar_lea.vmem [#allocation2], %s2281_s10  ;;  %v1869_v0 = vmov (!%p1267_p12), 0.0|0.0   ;;  %v958_v1 = vld [vmem:[#allocation14] sm:$0xff] (!%p1267_p12)  ;;  %v959_v2 = vld [vmem:[#allocation14 + $0x8] sm:$0xff] (!%p1267_p12)  ;;  %v960_v5 = vld [vmem:[#allocation14 + $0x10] sm:$0xff] (!%p1267_p12) }
 0x24d   : > { %v760_v42 = vld [vmem:[%s759_s3] sm:$0xff]  ;;  %s761_s12 = scalar_lea.vmem [#allocation4], %s2281_s10  ;;  %s928_s30 = scalar_lea.vmem [#allocation5], %s2281_s10  ;;  %v1374_v4 = vpack.c.bf16 (!%p1267_p12), %v959_v2, %v958_v1  ;;  %v961_v6 = vld [vmem:[#allocation14 + $0x18] sm:$0xff] (!%p1267_p12)  ;;  %vm1871_vm5 = vmmov (!%p1267_p12), 0   ;;  %v1872_v7 = vmov (!%p1267_p12), 0.0  }
 0x24e   : > { %1335 = vmatpush3.xpose.msk.msra.mxu0 %vm764_vm3, %v760_v42  ;;  %v758_v43 = vld [vmem:[%s757_s7] sm:$0xff]  ;;  %s1868_s3 = smov (!%p1267_p12), 8   ;;  %s1870_s7 = smov (!%p1267_p12), 24   ;;  %v1377_v8 = vpack.c.bf16 (!%p1267_p12), %v961_v6, %v960_v5  ;;  %vm954_vm6 = vcmask (!%p1267_p12), 130048   ;;  %vm956_vm7 = vcmask (!%p1267_p12), 195584   ;;  %vm969_vm8 = vcmask (!%p1267_p12), 261120  }
 0x24f   : > { %v762_v55 = vld [vmem:[%s761_s12] sm:$0xff]  ;;  %1373 = vmatprep.subr.bf16.mxu0 (!%p1267_p12), %v1869_v0  ;;  %s1873_s25 = smov (!%p1267_p12), 16   ;;  %s2470_s26 = sld [smem:[#allocation36_spill]] (!%p1267_p12) }
 0x250   : > { %1340 = vmatpush3.msra.mxu1 %v762_v55 }
 0x251   : > { %1337 = vmatmul.mubr.msk.f32.vlgmr.msra.gmra.mrb[0].mxu0 %vm764_vm3, %v758_v43 }
 0x252   : > { %1352 = vmatprep.mubr.msk.f32.mxu0 (!%p1267_p12), %vm1871_vm5, %v1872_v7  ;;  %1375 = vmatpush3.bf16.msra.mxu0 (!%p1267_p12), %v1374_v4 }
 0x253   : > { %1376 = vmatprep.subr.bf16.mxu0 (!%p1267_p12), %v1869_v0 }
 0x255   : > { %v1268_v16 = vld [vmem:[%s2470_s26] ss:$0 sm:$0xff] (!%p1267_p12) }
 0x256   : > { %1378 = vmatpush3.bf16.msra.mxu0 (!%p1267_p12), %v1377_v8 }
 0x324   : > { %v837_v45 = vpop.f32.mrb[0].mxu0 }
 0x325   : > { %v838_v46 = vadd.f32 %v837_v45, %v763_v44  ;;  %v1338_v47 = vpop.f32.mrb[1].mxu0 }
 0x327   : > { %841 = vst.msk [vmem:[%s2421_s11] sm:$0xff] %vm764_vm3, %v838_v46  ;;  %v842_v48 = vsel %vm764_vm3, %v838_v46, -inf }
 0x328   : > { %843 = vmax.xlane.f32.xlu0 %v842_v48 }
 0x3b5   : > { %v844_v49 = vpop.xlane.xlu0 %843 }
 0x3b6   : > { %v845_v50 = vmax.f32 %v844_v49, -1e+30 }
 0x3b8   : > { %v846_v51 = vsub.f32 %v838_v46, %v845_v50 }
 0x3ba   : > { %v847_v52 = vmul.f32 1.442695, %v846_v51 }
 0x3bc   : > { %1543 = vpow2.f32 %v847_v52 }
 0x3c6   : > { %v1544_v53 = vpop.eup %1543 }
 0x3c7   : > { %v849_v54 = vsel %vm764_vm3, %v1544_v53, 0.0 }
 0x3c8   : > { %850 = vadd.xlane.f32.xlu0 %v849_v54 }
 0x455   : > { %v851_v56 = vpop.xlane.xlu0 %850 }
 0x456   : > { %v852_v57 = vmax.f32 %v851_v56, 1e-30 }
 0x458   : > { %1545 = vrcp.f32 %v852_v57 }
 0x462   : > { %v1546_v58 = vpop.eup %1545 }
 0x463   : > { %v854_v59 = vmul.f32 %v1546_v58, %v1544_v53 }
 0x465   : > { %1342 = vmatmul.mubr.msk.f32.vlgmr.msra.gmra.mrb[0].mxu1 %vm764_vm3, %v854_v59 }
 0x533   : > { %933 = sbr.rel (%p1267_p12) target bundleno = 1681 (0x691), region = 84 }
 0x538   : > { %v924_v60 = vpop.f32.mrb[0].mxu1 }
 0x539   : > { %929 = vst.msk [vmem:[%s928_s30] sm:$0xff] %vm764_vm3, %v924_v60  ;;  %v1343_v61 = vpop.f32.mrb[1].mxu1 }
 0x540   : > { %v936_v62 = vld [vmem:[#allocation5 + $0x8] sm:$0xff]  ;;  %v940_v63 = vld [vmem:[#allocation5 + $0x18] sm:$0xff]  ;;  %v938_v3 = vld [vmem:[#allocation5 + $0x10] sm:$0xff] }
 0x541   : > { %942 = vrot.lane.b32.xlu0 %v936_v62, %s1868_s3  ;;  %950 = vrot.lane.b32.xlu1 %v940_v63, %s1870_s7  ;;  %v934_v10 = vld [vmem:[#allocation5] sm:$0xff] }
 0x545   : > { %946 = vrot.lane.b32.xlu0 %v938_v3, %s1873_s25 }
 0x5b3   : > { %v943_v9 = vpop.permute.xlu0 %942  ;;  %v951_v11 = vpop.permute.xlu1 %950 }
 0x5b4   : > { %v953_v12 = vsel %vm764_vm3, %v934_v10, %v943_v9 }
 0x5b7   : > { %v947_v13 = vpop.permute.xlu0 %946 }
 0x5b8   : > { %v955_v14 = vsel %vm954_vm6, %v953_v12, %v947_v13 }
 0x5b9   : > { %v957_v15 = vsel %vm956_vm7, %v955_v14, %v951_v11 }
 0x5ba   : > { %1353 = vmatmul.mubr.msk.f32.vlgmr.msra.gmra.mrb[0].mxu0 %vm969_vm8, %v957_v15 }
 0x68d   : > { %v1039_v17 = vpop.f32.mrb[0].mxu0 }
 0x68e   : > { %v1040_v18 = vadd.f32 %v1268_v16, %v1039_v17  ;;  %v1354_v19 = vpop.f32.mrb[1].mxu0 }
 0x690   : > { %1043 = vst.msk [vmem:[%s2254_s20] sm:$0xff] %vm969_vm8, %v1040_v18 }
 0x691 PF: > { %s2471_s24 = sld [smem:[#allocation24_spill]]  ;;  %s2472_s7 = sld [smem:[#allocation38_spill]] }
 0x692   : > { %s1063_s4 = sshll.u32 %s2254_s20, 4  ;;  %s1045_s11 = scalar_lea.sflag [#allocation8], %s2231_s19  ;;  %s1064_s4 = int_to_ptr.vmem [resolvable:$true] %s1063_s4 }
 0x693   : > { %s1689_s10 = scalar_lea.vmem %s1064_s4, 128  ;;  %p2473_p5 = scmp.ne.s32.totalorder %s2455_s27, 0 }
 0x694   : > { %p1690_p11 = scmp.ne.s32.totalorder %s1064_s4, %s1689_s10  ;;  %s1874_s5 = smov [#allocation15]  }
 0x695   : > { %s1693_s26 = sshll.u32 %s1874_s5, 4  ;;  %s1694_s26 = int_to_ptr.vmem [resolvable:$false] %s1693_s26 }
 0x696   : > { %p1691_p6 = pnand %p1690_p11, %p2473_p5  ;;  %s1695_s0 = scalar_lea.vmem %s1694_s26, 256 }
 0x697   : > { %s1272_s12 = sshll.u32 %s2471_s24, 7  ;;  %p1696_p3 = scmp.lt.s32.totalorder %s1064_s4, %s1694_s26 }
 0x698   : > { %s2309_s25 = scalar_lea.hbm %s2472_s7, %s1272_s12  ;;  %p1692_p10 = pneg %p1691_p6 }
 0x699   : > { %p1697_p0 = scmp.lt.s32.totalorder %s1695_s0, %s1689_s10 }
 0x69b   : > { %p1698_p8 = por %p1697_p0, %p1696_p3 }
 0x69d   : > { %p1699_p13 = pnand %p1698_p8, %p1692_p10 }
 0x69f   : > { %1702 = shalt.err (!%p1699_p13)
}
 0x6a0   : > { %s1703_s19 = scalar_lea.hbm %s2309_s25, 128  ;;  %s1707_s30 = scalar_lea.hbm %s2472_s7, 256 }
 0x6a1   : > { %p1704_p7 = scmp.ne.s32.totalorder %s2309_s25, %s1703_s19  ;;  %p1708_p4 = scmp.lt.u32.totalorder %s2309_s25, %s2472_s7 }
 0x6a2   : > { %p1709_p2 = scmp.lt.u32.totalorder %s1707_s30, %s1703_s19  ;;  %p1711_p11 = scmp.lt.u32.totalorder %s1703_s19, %s2309_s25 }
 0x6a3   : > { %p1705_p1 = pnand %p1704_p7, %p2473_p5 }
 0x6a4   : > { %p1710_p12 = por %p1709_p2, %p1708_p4 }
 0x6a5   : > { %p1706_p9 = pneg %p1705_p1 }
 0x6a6   : > { %p1712_p6 = por %p1711_p11, %p1710_p12 }
 0x6a8   : > { %p1713_p10 = pnand %p1712_p6, %p1706_p9 }
 0x6aa   : > { %1716 = shalt.err (!%p1713_p10)
}
 0x6ab   : > { %s2474_s0 = sld [smem:[#allocation23_spill]]  ;;  %s1273_s10 = sshll.u32 %s2471_s24, 2 }
 0x6ac   : > { %1397 = dma.vmem_to_hbm [thread:$0]  (%p2473_p5), %s1064_s4, 128, %s2309_s25, %s1045_s11  }
 0x6ad   : > { %s2475_s26 = scalar_lea.vmem [#allocation16], %s2252_s6  ;;  %s2476_s27 = sld [smem:[#allocation39_spill]] }
 0x6ae   : > { %s1078_s20 = sshll.u32 %s2475_s26, 4  ;;  %s2477_s7 = sand.u32 1, %s1815_s14   ;;  %s2334_s20 = int_to_ptr.vmem [resolvable:$true] %s1078_s20 }
 0x6af   : > { %s1050_s29 = scalar_lea.sflag [#allocation17], %s2477_s7  ;;  %s1717_s22 = scalar_lea.vmem %s2334_s20, 128 }
 0x6b0   : > { %p1718_p3 = scmp.ne.s32.totalorder %s2334_s20, %s1717_s22  ;;  %p2478_p0 = scmp.ne.s32.totalorder %s2458_s9, 0 }
 0x6b1   : > { %s1074_s12 = sadd.s32 %s2474_s0, %s1273_s10  ;;  %s1875_s4 = smov [#allocation16]  }
 0x6b2   : > { %s1274_s19 = sshll.u32 %s1074_s12, 7  ;;  %p1719_p5 = pnand %p1718_p3, %p2478_p0 }
 0x6b3   : > { %s1076_s5 = scalar_lea.hbm %s2476_s27, %s1274_s19  ;;  %s1721_s6 = sshll.u32 %s1875_s4, 4  ;;  %s1722_s6 = int_to_ptr.vmem [resolvable:$false] %s1721_s6 }
 0x6b4   : > { %p1720_p8 = pneg %p1719_p5  ;;  %s1723_s11 = scalar_lea.vmem %s1722_s6, 256 }
 0x6b5   : > { %p1724_p13 = scmp.lt.s32.totalorder %s2334_s20, %s1722_s6  ;;  %p1725_p7 = scmp.lt.s32.totalorder %s1723_s11, %s1717_s22 }
 0x6b7   : > { %p1726_p1 = por %p1725_p7, %p1724_p13 }
 0x6b9   : > { %p1727_p9 = pnand %p1726_p1, %p1720_p8 }
 0x6bb   : > { %1730 = shalt.err (!%p1727_p9)
}
 0x6bc   : > { %s1731_s24 = scalar_lea.hbm %s1076_s5, 128  ;;  %s1735_s0 = scalar_lea.hbm %s2476_s27, 1024 }
 0x6bd   : > { %p1732_p4 = scmp.ne.s32.totalorder %s1076_s5, %s1731_s24  ;;  %p1736_p11 = scmp.lt.u32.totalorder %s1076_s5, %s2476_s27 }
 0x6be   : > { %p1737_p6 = scmp.lt.u32.totalorder %s1735_s0, %s1731_s24  ;;  %p1739_p3 = scmp.lt.u32.totalorder %s1731_s24, %s1076_s5 }
 0x6bf   : > { %p1733_p2 = pnand %p1732_p4, %p2478_p0 }
 0x6c0   : > { %p1738_p10 = por %p1737_p6, %p1736_p11 }
 0x6c1   : > { %p1734_p12 = pneg %p1733_p2 }
 0x6c2   : > { %p1740_p5 = por %p1739_p3, %p1738_p10 }
 0x6c4   : > { %p1741_p8 = pnand %p1740_p5, %p1734_p12 }
 0x6c6   : > { %1744 = shalt.err (!%p1741_p8)
}
 0x6c7   : > { %1398 = dma.vmem_to_hbm [thread:$0]  (%p2478_p0), %s2334_s20, 128, %s1076_s5, %s1050_s29  }
 0x6c8 PF: > { %p1434_p13 = scmp.ge.s32.totalorder %s1851_s23, 2  ;;  %s1090_s22 = sand.u32 1, %s1823_s16  }
 0x6c9   : > { %p2479_p7 = scmp.ne.s32.totalorder %s2457_s28, 0  ;;  %s1091_s12 = scalar_lea.sflag [#allocation8], %s1090_s22 }
 0x6cb   : > { %p1419_p1 = pnand %p1434_p13, %p2479_p7 }
 0x6cd   : > { %1802 = dma.done.wait (!%p1419_p1), %s1091_s12, 128  }
 0x6ce   : > { %1804 = vsyncadd (!%p1419_p1), %s1091_s12, 4294967168  ;;  %s1099_s19 = sand.u32 1, %s1811_s13   ;;  %p2480_p9 = scmp.ne.s32.totalorder %s2459_s1, 0 }
 0x6cf   : > { %s1100_s30 = scalar_lea.sflag [#allocation17], %s1099_s19 }
 0x6d0   : > { %p1422_p4 = pnand %p1434_p13, %p2480_p9 }
 0x6d2   : > { %1806 = dma.done.wait (!%p1422_p4), %s1100_s30, 128  }
 0x6d3   : > { %1808 = vsyncadd (!%p1422_p4), %s1100_s30, 4294967168  ;;  %s32_s23 = sadd.s32 1, %s1851_s23   ;;  %s2481_s20 = sld [smem:[#allocation25_spill]] }
 0x6d4   : > { %p29_p0 = scmp.ge.s32.totalorder %s32_s23, 10   ;;  %s2482_s29 = sld [smem:[#allocation27_spill]] }
 0x6d5   : > { %s2483_s22 = sld [smem:[#allocation28_spill]]  ;;  %s2484_s13 = smov %s1815_s14 }
 0x6d6   : > { %s2485_s14 = smov %s1819_s15  ;;  %s2486_s15 = smov %s2174_s8 }
 0x6d7   : > { %s2487_s16 = smov %s1827_s17  ;;  %s2488_s17 = smov %s1831_s18 }
 0x6d8   : > { %s2489_s18 = smov %s2166_s2  ;;  %s2490_s19 = smov %s1843_s21 }
 0x6d9   :  { %31 = sbr.rel (!%p29_p0) target bundleno = 25 (0x19), region = 158 }
 0x6da   : > { %s2491_s21 = smov %s2482_s29 }
 0x6e0   :  { %1105 = vsyncpa [#allocation7], 1 }
 0x6e1   :  { %1107 = vsyncpa [#allocation7 + $0x1], 1 }
 0x6e2   :  { %1108 = vsyncpa [#allocation10], 1 }
 0x6e3   :  { %1109 = vsyncpa [#allocation13], 1 }
 0x6e4   :  { %1110 = vsyncpa [#allocation8], 1 }
 0x6e5   :  { %1112 = vsyncpa [#allocation8 + $0x1], 1 }
 0x6e6   :  { %1113 = vsyncpa [#allocation17], 1 }
 0x6e7   :  { %1115 = vsyncpa [#allocation17 + $0x1], 1 }

// kernel: tpu_custom_call.1
= control target key start
LH: loop header
LB: loop body
LE: loop exit
PB: predicated region body
PF: predicated region fallthrough
CT: control target
= control target key end

     0   :  { %s2397_s0 = inlined_call_operand.hbm [shape: f32[2,8,32], index: 0, kind: input, shape index: {}]   ;;  %s2398_s1 = inlined_call_operand.hbm [shape: f32[32,32], index: 1, kind: input, shape index: {}]   ;;  %s2399_s2 = inlined_call_operand.vmem [shape: f32[1,32], index: 2, kind: input, shape index: {}]   ;;  %s2400_s3 = inlined_call_operand.hbm [shape: f32[32,32], index: 3, kind: input, shape index: {}]   ;;  %s2401_s4 = inlined_call_operand.hbm [shape: f32[32,32], index: 4, kind: input, shape index: {}]   ;;  %s2402_s5 = inlined_call_operand.vmem [shape: f32[1,32], index: 5, kind: input, shape index: {}]   ;;  %s2403_s6 = inlined_call_operand.hbm [shape: f32[32,32], index: 6, kind: input, shape index: {}]   ;;  %s2404_s7 = inlined_call_operand.vmem [shape: f32[1,32], index: 7, kind: input, shape index: {}]   ;;  %s2405_s8 = inlined_call_operand.vmem [shape: f32[8,8], index: 8, kind: input, shape index: {}]   ;;  %s2406_s9 = inlined_call_operand.hbm [shape: f32[2,8,32], index: 9, kind: output, shape index: {0}]   ;;  %s2407_s10 = inlined_call_operand.hbm [shape: f32[2,4,8,8], index: 10, kind: output, shape index: {1}]  }
   0x1   :  { %2425 = sst [smem:[#allocation29_spill]] %s2397_s0 }
   0x2   :  { %2426 = sst [smem:[#allocation30_spill]] %s2398_s1 }
   0x3   :  { %2427 = sst [smem:[#allocation31_spill]] %s2399_s2 }
   0x4   :  { %2428 = sst [smem:[#allocation32_spill]] %s2400_s3 }
   0x5   :  { %2429 = sst [smem:[#allocation33_spill]] %s2401_s4 }
   0x6   :  { %2430 = sst [smem:[#allocation34_spill]] %s2402_s5 }
   0x7   :  { %2431 = sst [smem:[#allocation35_spill]] %s2403_s6 }
   0x8   :  { %2432 = sst [smem:[#allocation36_spill]] %s2404_s7 }
   0x9   :  { %2433 = sst [smem:[#allocation37_spill]] %s2405_s8 }
   0xa   :  { %2434 = sst [smem:[#allocation38_spill]] %s2406_s9 }
   0xb   :  { %2435 = sst [smem:[#allocation39_spill]] %s2407_s10 }
   0xc   :  { %16 = vsyncpa [#allocation7], 0 }
   0xd   :  { %18 = vsyncpa [#allocation7 + $0x1], 0 }
   0xe   :  { %19 = vsyncpa [#allocation10], 0 }
   0xf   :  { %20 = vsyncpa [#allocation13], 0 }
  0x10   :  { %21 = vsyncpa [#allocation8], 0 }
  0x11   :  { %23 = vsyncpa [#allocation8 + $0x1], 0 }
  0x12   :  { %24 = vsyncpa [#allocation17], 0 }
  0x13   :  { %26 = vsyncpa [#allocation17 + $0x1], 0  ;;  %s1931_s13 = smov 0   ;;  %s1933_s14 = smov 0  }
  0x14   :  { %s1935_s15 = smov 0   ;;  %s1937_s16 = smov 0  }
  0x15   :  { %s1939_s17 = smov 0   ;;  %s1941_s18 = smov 0  }
  0x16   :  { %s1943_s19 = smov 0   ;;  %s1945_s20 = smov 0  }
  0x17   :  { %s1947_s21 = smov 0   ;;  %s1949_s22 = smov 0  }
  0x18   :  { %s1951_s23 = smov 0  }
  0x19 LB: > { %2436 = sst [smem:[#allocation23_spill]] %s1835_s19  ;;  %s2408_s24 = sadd.s32 4294967295, %s1851_s23   ;;  %s1851_s23 = sphi %s1951_s23, %s32_s23   ;;  %s1847_s22 = sphi %s1949_s22, %s2483_s22   ;;  %s1843_s21 = sphi %s1947_s21, %s2491_s21   ;;  %s1839_s20 = sphi %s1945_s20, %s2481_s20   ;;  %s1835_s19 = sphi %s1943_s19, %s2490_s19   ;;  %s1831_s18 = sphi %s1941_s18, %s2489_s18   ;;  %s1827_s17 = sphi %s1939_s17, %s2488_s17   ;;  %s1823_s16 = sphi %s1937_s16, %s2487_s16   ;;  %s1819_s15 = sphi %s1935_s15, %s2486_s15   ;;  %s1815_s14 = sphi %s1933_s14, %s2485_s14   ;;  %s1811_s13 = sphi %s1931_s13, %s2484_s13  }
  0x1a   : > { %2437 = sst [smem:[#allocation24_spill]] %s1839_s20  ;;  %p1241_p0 = scmp.ge.s32.totalorder %s1851_s23, 1 }
  0x1b   : > { %2438 = sst [smem:[#allocation25_spill]] %s1847_s22  ;;  %p1990_p1 = scmp.eq.s32.totalorder %s2408_s24, 0 }
  0x1c   : > { %p297_p2 = scmp.lt.s32.totalorder %s1851_s23, 9  ;;  %s1853_s27 = smov [#allocation9]  }
  0x1d   : > { %s2439_s25 = scalar_select %p1990_p1, 1, 0 }
  0x1e   : > { %p1995_p3 = pnand %p1241_p0, %p297_p2  ;;  %s309_s28 = sshll.u32 %s1853_s27, 4  ;;  %s1999_s28 = int_to_ptr.vmem [resolvable:$true] %s309_s28 }
  0x1f   : > { %s1854_s30 = smov [#allocation12]   ;;  %s1855_s12 = smov [#allocation11]  }
  0x20   : > { %s2440_s26 = scalar_select %p1995_p3, 1, 0 }
  0x21   : > { %p1401_p4 = pneg %p1995_p3  ;;  %s338_s11 = sshll.u32 %s1854_s30, 4  ;;  %s2009_s11 = int_to_ptr.vmem [resolvable:$true] %s338_s11 }
  0x22   : > { %2441 = sst [smem:[#allocation26_spill]] %s2440_s26  ;;  %s2011_s24 = sshll.u32 %s1855_s12, 4  ;;  %s326_s24 = int_to_ptr.vmem [resolvable:$true] %s2011_s24 }
  0x23   : > { %p2005_p5 = pnand %p1401_p4, %p1990_p1  ;;  %s2443_s1 = sld [smem:[#allocation30_spill]] }
  0x25   : > { %p2021_p7 = pneg %p2005_p5 }
  0x29   : > { %s1547_s27 = scalar_lea.hbm %s2443_s1, 512 }
  0x2a   : > { %p1548_p6 = scmp.ne.s32.totalorder %s2443_s1, %s1547_s27  ;;  %p1554_p10 = scmp.lt.u32.totalorder %s1547_s27, %s2443_s1 }
  0x2c   : > { %p1550_p8 = pnand %p2021_p7, %p1548_p6 }
  0x2e   : > { %p1551_p9 = pneg %p1550_p8 }
  0x30   : > { %p1556_p11 = pnand %p1554_p10, %p1551_p9 }
  0x32   : > { %1559 = shalt.err (!%p1556_p11)
}
  0x33   : > { %s1560_s7 = scalar_lea.vmem %s1999_s28, 512  ;;  %p1568_p2 = scmp.lt.s32.totalorder %s1999_s28, %s1999_s28 }
  0x34   : > { %p1561_p12 = scmp.ne.s32.totalorder %s1999_s28, %s1560_s7  ;;  %p1569_p4 = scmp.lt.s32.totalorder %s1560_s7, %s1560_s7 }
  0x36   : > { %p1563_p13 = pnand %p1561_p12, %p2021_p7  ;;  %p1570_p6 = por %p1569_p4, %p1568_p2 }
  0x38   : > { %p1564_p0 = pneg %p1563_p13 }
  0x3a   : > { %p1571_p8 = pnand %p1570_p6, %p1564_p0 }
  0x3c   : > { %1574 = shalt.err (!%p1571_p8)
}
  0x3d   : > { %s1856_s9 = smov 128   ;;  %s1857_s10 = smov 8  }
  0x3e   : > { %1404 = dma.hbm_to_vmem [thread:$0]  (!%p2005_p5), %s2443_s1, 512, %s1999_s28, [#allocation10], %s1856_s9, %s1856_s9, %s1857_s10  }
  0x3f   : > { %s2445_s4 = sld [smem:[#allocation33_spill]] }
  0x45   : > { %s1575_s7 = scalar_lea.hbm %s2445_s4, 512 }
  0x46   : > { %p1576_p9 = scmp.ne.s32.totalorder %s2445_s4, %s1575_s7  ;;  %p1582_p12 = scmp.lt.u32.totalorder %s1575_s7, %s2445_s4 }
  0x48   : > { %p1578_p10 = pnand %p1576_p9, %p2021_p7 }
  0x4a   : > { %p1579_p11 = pneg %p1578_p10 }
  0x4c   : > { %p1584_p13 = pnand %p1582_p12, %p1579_p11 }
  0x4e   : > { %1587 = shalt.err (!%p1584_p13)
}
  0x4f   : > { %s1588_s28 = scalar_lea.vmem %s2009_s11, 512  ;;  %p1596_p6 = scmp.lt.s32.totalorder %s2009_s11, %s2009_s11 }
  0x50   : > { %p1589_p0 = scmp.ne.s32.totalorder %s2009_s11, %s1588_s28  ;;  %p1597_p8 = scmp.lt.s32.totalorder %s1588_s28, %s1588_s28 }
  0x52   : > { %p1591_p2 = pnand %p1589_p0, %p2021_p7  ;;  %p1598_p9 = por %p1597_p8, %p1596_p6 }
  0x54   : > { %p1592_p4 = pneg %p1591_p2 }
  0x56   : > { %p1599_p10 = pnand %p1598_p9, %p1592_p4 }
  0x58   : > { %1602 = shalt.err (!%p1599_p10)
}
  0x59   : > { %1410 = dma.hbm_to_vmem [thread:$0]  (!%p2005_p5), %s2445_s4, 512, %s2009_s11, [#allocation13], %s1856_s9, %s1856_s9, %s1857_s10  }
  0x5a   : > { %s2446_s3 = sld [smem:[#allocation32_spill]] }
  0x60   : > { %s1603_s20 = scalar_lea.hbm %s2446_s3, 512 }
  0x61   : > { %p1604_p11 = scmp.ne.s32.totalorder %s2446_s3, %s1603_s20  ;;  %p1610_p0 = scmp.lt.u32.totalorder %s1603_s20, %s2446_s3 }
  0x63   : > { %p1606_p12 = pnand %p1604_p11, %p2021_p7 }
  0x65   : > { %p1607_p13 = pneg %p1606_p12 }
  0x67   : > { %p1612_p2 = pnand %p1610_p0, %p1607_p13 }
  0x69   : > { %1615 = shalt.err (!%p1612_p2)
}
  0x6a   : > { %s1616_s28 = scalar_lea.vmem %s326_s24, 512  ;;  %p1624_p9 = scmp.lt.s32.totalorder %s326_s24, %s326_s24 }
  0x6b   : > { %p1617_p4 = scmp.ne.s32.totalorder %s326_s24, %s1616_s28  ;;  %p1625_p10 = scmp.lt.s32.totalorder %s1616_s28, %s1616_s28 }
  0x6d   : > { %p1619_p6 = pnand %p1617_p4, %p2021_p7  ;;  %p1626_p3 = por %p1625_p10, %p1624_p9 }
  0x6f   : > { %p1620_p8 = pneg %p1619_p6 }
  0x71   : > { %p1627_p1 = pnand %p1626_p3, %p1620_p8 }
  0x73   : > { %1630 = shalt.err (!%p1627_p1)
}
  0x74   : > { %1407 = dma.hbm_to_vmem [thread:$0]  (!%p2005_p5), %s2446_s3, 512, %s326_s24, [#allocation10], %s1856_s9, %s1856_s9, %s1857_s10  }
  0x75   : > { %s1858_s5 = smov [#allocation14]   ;;  %s2447_s6 = sld [smem:[#allocation35_spill]] }
  0x76   : > { %s354_s19 = sshll.u32 %s1858_s5, 4  ;;  %s355_s19 = int_to_ptr.vmem [resolvable:$true] %s354_s19 }
  0x7b   : > { %s1631_s27 = scalar_lea.hbm %s2447_s6, 512 }
  0x7c   : > { %p1632_p1 = scmp.ne.s32.totalorder %s2447_s6, %s1631_s27  ;;  %p1638_p12 = scmp.lt.u32.totalorder %s1631_s27, %s2447_s6 }
  0x7e   : > { %p1634_p3 = pnand %p1632_p1, %p2021_p7 }
  0x80   : > { %p1635_p11 = pneg %p1634_p3 }
  0x82   : > { %p1640_p13 = pnand %p1638_p12, %p1635_p11 }
  0x84   : > { %1643 = shalt.err (!%p1640_p13)
}
  0x85   : > { %s1644_s24 = scalar_lea.vmem %s355_s19, 512  ;;  %p1652_p6 = scmp.lt.s32.totalorder %s355_s19, %s355_s19 }
  0x86   : > { %p1645_p0 = scmp.ne.s32.totalorder %s355_s19, %s1644_s24  ;;  %p1653_p8 = scmp.lt.s32.totalorder %s1644_s24, %s1644_s24 }
  0x88   : > { %p1647_p2 = pnand %p1645_p0, %p2021_p7  ;;  %p1654_p9 = por %p1653_p8, %p1652_p6 }
  0x8a   : > { %p1648_p4 = pneg %p1647_p2 }
  0x8c   : > { %p1655_p10 = pnand %p1654_p9, %p1648_p4 }
  0x8e   : > { %1658 = shalt.err (!%p1655_p10)
}
  0x8f   : > { %1413 = dma.hbm_to_vmem [thread:$0]  (!%p2005_p5), %s2447_s6, 512, %s355_s19, [#allocation13], %s1856_s9, %s1856_s9, %s1857_s10  }
  0x90   : > { %s1240_s8 = sadd.s32 4294967294, %s1851_s23   ;;  %s41_s29 = sadd.s32 1, %s1843_s21 }
  0x91   : > { %p42_p7 = scmp.ge.s32.totalorder %s41_s29, 4  ;;  %s44_s5 = sadd.s32 1, %s1847_s22 }
  0x92   : > { %s51_s26 = sadd.s32 1, %s1831_s18  ;;  %p58_p1 = scmp.ne.s32.totalorder %s1831_s18, %s1827_s17 }
  0x93   : > { %s2493_s29 = smov (%p42_p7, %s41_s29), 0  ;;  %s2495_s5 = smov (!%p42_p7, %s44_s5), %s1847_s22 }
  0x94   : > { %2448 = sst [smem:[#allocation27_spill]] %s2493_s29  ;;  %p59_p3 = scmp.eq.s32.totalorder %s1851_s23, 0 }
  0x95   : > { %p64_p11 = scmp.ne.s32.totalorder %s1827_s17, %s1823_s16  ;;  %p46_p12 = scmp.ge.s32.totalorder %s2495_s5, 2 }
  0x96   : > { %s2449_s9 = sadd.s32 4294967295, %s1851_s23   ;;  %p2132_p13 = por %p59_p3, %p58_p1 }
  0x97   : > { %p2128_p5 = scmp.eq.s32.totalorder %s2449_s9, 7  ;;  %p2452_p0 = scmp.ne.s32.totalorder %s2439_s25, 0 }
  0x98   : > { %s2497_s5 = smov (%p46_p12, %s2495_s5), 0  ;;  %p2150_p6 = scmp.eq.s32.totalorder %s1240_s8, 7 }
  0x99   : > { %p2138_p2 = por %p2452_p0, %p64_p11  ;;  %2454 = sst [smem:[#allocation28_spill]] %s2497_s5 }
  0x9a   : > { %p2146_p4 = por %p2128_p5, %p58_p1  ;;  %s48_s12 = ssub.s32 %s1847_s22, %s2497_s5 }
  0x9b   : > { %s269_s7 = ssub.s32 %s1843_s21, %s2493_s29  ;;  %p49_p8 = scmp.eq.s32.totalorder %s48_s12, 0 }
  0x9c   : > { %s2455_s27 = scalar_select %p2146_p4, 1, 0 }
  0x9d   : > { %p2160_p9 = por %p2150_p6, %p64_p11  ;;  %s270_s24 = sor.u32 %s269_s7, %s48_s12 }
  0x9e   : > { %s273_s11 = sadd.s32 1, %s1819_s15  ;;  %p271_p10 = scmp.eq.s32.totalorder %s270_s24, 0 }
  0x9f   : > { %s2457_s28 = scalar_select %p2160_p9, 1, 0 }
  0xa0   : > { %s2166_s2 = scalar_select %p49_p8, %s1831_s18, %s51_s26  }
  0xa1   : > { %p283_p7 = scmp.ne.s32.totalorder %s1819_s15, %s1815_s14  ;;  %p289_p1 = scmp.ne.s32.totalorder %s1815_s14, %s1811_s13 }
  0xa2   : > { %p1429_p3 = scmp.lt.s32.totalorder %s1851_s23, 8  ;;  %s374_s12 = sand.u32 1, %s1831_s18  }
  0xa3   : > { %s2174_s8 = scalar_select %p271_p10, %s1819_s15, %s273_s11  }
  0xa4   : > { %p2178_p12 = por %p283_p7, %p2128_p5  ;;  %p2184_p11 = por %p289_p1, %p2150_p6 }
  0xa5   : > { %s1248_s7 = sshll.u32 %s1847_s22, 7  ;;  %s1247_s26 = sshll.u32 %s374_s12, 3 }
  0xa6   : > { %s2458_s9 = scalar_select %p2178_p12, 1, 0 }
  0xa7   : > { %s2459_s1 = scalar_select %p2184_p11, 1, 0 }
  0xa8   : > { %s2460_s0 = sld [smem:[#allocation29_spill]]  ;;  %s378_s10 = scalar_lea.vmem [#allocation6], %s1247_s26 }
  0xa9   : > { %s385_s11 = sshll.u32 %s378_s10, 4  ;;  %p2197_p5 = pnand %p1429_p3, %p2132_p13  ;;  %s2201_s11 = int_to_ptr.vmem [resolvable:$true] %s385_s11 }
  0xaa   : > { %s375_s6 = scalar_lea.sflag [#allocation7], %s374_s12 }
  0xab   : > { %p1661_p6 = pneg %p2197_p5 }
  0xae   : > { %s2193_s4 = scalar_lea.hbm %s2460_s0, %s1248_s7  ;;  %s1664_s19 = scalar_lea.hbm %s2460_s0, 256 }
  0xaf   : > { %s1659_s5 = scalar_lea.hbm %s2193_s4, 128  ;;  %p1665_p13 = scmp.lt.u32.totalorder %s2193_s4, %s2460_s0 }
  0xb0   : > { %p1660_p0 = scmp.ne.s32.totalorder %s2193_s4, %s1659_s5  ;;  %p1666_p7 = scmp.lt.u32.totalorder %s1664_s19, %s1659_s5 }
  0xb1   : > { %p1668_p3 = scmp.lt.u32.totalorder %s1659_s5, %s2193_s4 }
  0xb2   : > { %p1662_p8 = pnand %p1661_p6, %p1660_p0  ;;  %p1667_p1 = por %p1666_p7, %p1665_p13 }
  0xb4   : > { %p1663_p10 = pneg %p1662_p8  ;;  %p1669_p11 = por %p1668_p3, %p1667_p1 }
  0xb6   : > { %p1670_p9 = pnand %p1669_p11, %p1663_p10 }
  0xb8   : > { %1673 = shalt.err (!%p1670_p9)
}
  0xb9   : > { %s1674_s12 = scalar_lea.vmem %s2201_s11, 128  ;;  %s1859_s10 = smov [#allocation6]  }
  0xba   : > { %p1675_p0 = scmp.ne.s32.totalorder %s2201_s11, %s1674_s12  ;;  %s1679_s3 = sshll.u32 %s1859_s10, 4  ;;  %s1680_s3 = int_to_ptr.vmem [resolvable:$false] %s1679_s3 }
  0xbb   : > { %s1681_s7 = scalar_lea.vmem %s1680_s3, 256  ;;  %p1682_p4 = scmp.lt.s32.totalorder %s2201_s11, %s1680_s3 }
  0xbc   : > { %p1677_p8 = pnand %p1675_p0, %p1661_p6  ;;  %p1683_p13 = scmp.lt.s32.totalorder %s1681_s7, %s1674_s12 }
  0xbe   : > { %p1678_p12 = pneg %p1677_p8  ;;  %p1684_p7 = por %p1683_p13, %p1682_p4 }
  0xc0   : > { %p1685_p1 = pnand %p1684_p7, %p1678_p12 }
  0xc2   : > { %1688 = shalt.err (!%p1685_p1)
}
  0xc3   : > { %1417 = dma.hbm_to_vmem [thread:$0]  (!%p2197_p5), %s2193_s4, 128, %s2201_s11, %s375_s6  }
  0xc4   : > { %s2462_s5 = sld [smem:[#allocation26_spill]] }
  0xca   : > { %p2463_p9 = scmp.ne.s32.totalorder %s2462_s5, 0 }
  0xcb   : > { %s2231_s19 = sand.u32 (!%p2463_p9), 1, %s1827_s17  }
  0xcc   : > { %394 = sbr.rel (%p2463_p9) target bundleno = 1736 (0x6c8), region = 56  ;;  %s1250_s26 = sshll.u32 (!%p2463_p9), %s2231_s19, 3 }
  0xcd   : > { %s397_s24 = scalar_lea.sflag (!%p2463_p9), [#allocation7], %s2231_s19  ;;  %s2235_s12 = scalar_lea.vmem (!%p2463_p9), [#allocation6], %s1250_s26 }
  0xd3   : > { %1790 = dma.done.wait (%p2138_p2), %s397_s24, 128  }
  0xd4   : > { %1792 = vsyncadd (%p2138_p2), %s397_s24, 4294967168  ;;  %p2464_p4 = scmp.ne.s32.totalorder %s2439_s25, 0 }
  0xd6   : > { %1794 = dma.done.wait (%p2464_p4), [#allocation10], 1024  }
  0xd7   : > { %1796 = vsyncadd (%p2464_p4), [#allocation10], 4294966272 }
  0xd8   : > { %1798 = dma.done.wait (%p2464_p4), [#allocation13], 1024  }
  0xd9   : > { %1800 = vsyncadd (%p2464_p4), [#allocation13], 4294966272  ;;  %s2420_s4 = sand.u32 1, %s1815_s14   ;;  %s2254_s20 = scalar_lea.vmem [#allocation15], %s1250_s26 }
  0xda   : > { %s2252_s6 = sshll.u32 %s2420_s4, 3  ;;  %s2465_s30 = sld [smem:[#allocation23_spill]] }
  0xdb   : > { %s2421_s11 = scalar_lea.vmem [#allocation16], %s2252_s6 }
  0xe0   : > { %p1257_p2 = scmp.ne.s32.totalorder %s2465_s30, 0 }
  0xe1   : > { %v463_v0 = vld [vmem:[#allocation9] sm:$0xff] (!%p1257_p2)  ;;  %v464_v1 = vld [vmem:[#allocation9 + $0x8] sm:$0xff] (!%p1257_p2)  ;;  %v1860_v3 = vmov (!%p1257_p2), 0.0|0.0   ;;  %v465_v6 = vld [vmem:[#allocation9 + $0x10] sm:$0xff] (!%p1257_p2)  ;;  %vm1861_vm0 = vmmov (!%p1257_p2), 0   ;;  %v1862_v11 = vmov (!%p1257_p2), 0.0  }
  0xe2   : > { %461 = sbr.rel (%p1257_p2) target bundleno = 581 (0x245), region = 80  ;;  %v548_v2 = vld [vmem:[#allocation11] sm:$0xff] (!%p1257_p2)  ;;  %1355 = vmatprep.subr.bf16.mxu0 (!%p1257_p2), %v1860_v3  ;;  %1361 = vmatprep.subr.bf16.mxu1 (!%p1257_p2), %v1860_v3  ;;  %v1356_v4 = vpack.c.bf16 (!%p1257_p2), %v464_v1, %v463_v0  ;;  %v549_v5 = vld [vmem:[#allocation11 + $0x8] sm:$0xff] (!%p1257_p2)  ;;  %v466_v7 = vld [vmem:[#allocation9 + $0x18] sm:$0xff] (!%p1257_p2)  ;;  %vm474_vm1 = vcmask (!%p1257_p2), 261120   ;;  %s2466_s3 = sld [smem:[#allocation31_spill]] (!%p1257_p2) }
  0xe3   : > { %v1362_v8 = vpack.c.bf16 (!%p1257_p2), %v549_v5, %v548_v2  ;;  %v550_v9 = vld [vmem:[#allocation11 + $0x10] sm:$0xff] (!%p1257_p2)  ;;  %v551_v10 = vld [vmem:[#allocation11 + $0x18] sm:$0xff] (!%p1257_p2)  ;;  %1309 = vmatprep.mubr.msk.f32.mxu0 (!%p1257_p2), %vm1861_vm0, %v1862_v11  ;;  %1320 = vmatprep.mubr.msk.f32.mxu1 (!%p1257_p2), %vm1861_vm0, %v1862_v11  ;;  %v1359_v12 = vpack.c.bf16 (!%p1257_p2), %v466_v7, %v465_v6  ;;  %v622_v14 = vld [vmem:[#allocation12] sm:$0xff] (!%p1257_p2)  ;;  %vm704_vm2 = vcmask (!%p1257_p2), 64512   ;;  %s1863_s7 = smov (!%p1257_p2), 120   ;;  %s1864_s5 = smov (!%p1257_p2), 112  }
  0xe4   : > { %1357 = vmatpush3.bf16.msra.mxu0 (!%p1257_p2), %v1356_v4  ;;  %v1365_v13 = vpack.c.bf16 (!%p1257_p2), %v551_v10, %v550_v9  ;;  %v623_v15 = vld [vmem:[#allocation12 + $0x8] sm:$0xff] (!%p1257_p2)  ;;  %v462_v16 = vld [vmem:[%s2235_s12] sm:$0xff] (!%p1257_p2)  ;;  %s2467_s12 = sld [smem:[#allocation34_spill]] (!%p1257_p2)  ;;  %s1865_s30 = smov (!%p1257_p2), 104  }
  0xe5   : > { %1363 = vmatpush3.bf16.msra.mxu1 (!%p1257_p2), %v1362_v8  ;;  %1358 = vmatprep.subr.bf16.mxu0 (!%p1257_p2), %v1860_v3  ;;  %v1368_v17 = vpack.c.bf16 (!%p1257_p2), %v623_v15, %v622_v14  ;;  %v624_v18 = vld [vmem:[#allocation12 + $0x10] sm:$0xff] (!%p1257_p2)  ;;  %v625_v19 = vld [vmem:[#allocation12 + $0x18] sm:$0xff] (!%p1257_p2) }
  0xe6   : > { %1364 = vmatprep.subr.bf16.mxu1 (!%p1257_p2), %v1860_v3  ;;  %v1371_v20 = vpack.c.bf16 (!%p1257_p2), %v625_v19, %v624_v18 }
  0xe8   : > { %1360 = vmatpush3.bf16.msra.mxu0 (!%p1257_p2), %v1359_v12  ;;  %v1258_v21 = vld [vmem:[%s2466_s3] ss:$0 sm:$0xff] (!%p1257_p2) }
  0xe9   : > { %1366 = vmatpush3.bf16.msra.mxu1 %v1365_v13  ;;  %1367 = vmatprep.subr.bf16.mxu0 %v1860_v3 }
  0xea   : > { %v1261_v28 = vld [vmem:[%s2467_s12] ss:$0 sm:$0xff] }
  0xeb   : > { %1310 = vmatmul.mubr.msk.f32.vlgmr.msra.gmra.mrb[0].mxu0 %vm474_vm1, %v462_v16 }
  0xec   : > { %1321 = vmatmul.mubr.msk.f32.vlgmr.msra.gmra.mrb[0].mxu1 %vm474_vm1, %v462_v16  ;;  %1369 = vmatpush3.bf16.msra.mxu0 %v1368_v17 }
  0xed   : > { %1370 = vmatprep.subr.bf16.mxu0 %v1860_v3  ;;  %1331 = vmatprep.mubr.msk.f32.mxu0 %vm1861_vm0, %v1862_v11 }
  0xf0   : > { %1372 = vmatpush3.bf16.msra.mxu0 %v1371_v20 }
  0xf3   : > { %1332 = vmatmul.mubr.msk.f32.vlgmr.msra.gmra.mrb[2].mxu0 %vm474_vm1, %v462_v16 }
 0x1be   : > { %v544_v22 = vpop.f32.mrb[0].mxu0 }
 0x1bf   : > { %v545_v23 = vadd.f32 %v1258_v21, %v544_v22  ;;  %v618_v24 = vpop.f32.mrb[0].mxu1  ;;  %v1311_v25 = vpop.f32.mrb[1].mxu0 }
 0x1c0   : > { %706 = vst.msk [vmem:[#allocation3] sm:$0xff] %vm704_vm2, %v618_v24  ;;  %715 = vrot.lane.b32.xlu0 %v618_v24, %s1863_s7  ;;  %v1322_v26 = vpop.f32.mrb[1].mxu1 }
 0x1c1   : > { %v703_v27 = vmul.f32 0.35355338, %v545_v23 }
 0x1c3   : > { %705 = vst.msk [vmem:[#allocation2] sm:$0xff] %vm704_vm2, %v703_v27  ;;  %726 = vrot.lane.b32.xlu1 %v703_v27, %s1864_s5 }
 0x1c4   : > { %731 = vrot.lane.b32.xlu0 %v618_v24, %s1864_s5 }
 0x1c6   : > { %v699_v29 = vpop.f32.mrb[2].mxu0 }
 0x1c7   : > { %v700_v30 = vadd.f32 %v1261_v28, %v699_v29  ;;  %v1333_v31 = vpop.f32.mrb[3].mxu0 }
 0x1c8   : > { %709 = vrot.lane.b32.xlu0 %v703_v27, %s1863_s7 }
 0x1c9   : > { %707 = vst.msk [vmem:[#allocation4] sm:$0xff] %vm704_vm2, %v700_v30  ;;  %721 = vrot.lane.b32.xlu1 %v700_v30, %s1863_s7 }
 0x1cc   : > { %741 = vrot.lane.b32.xlu0 %v703_v27, %s1865_s30 }
 0x1cd   : > { %736 = vrot.lane.b32.xlu1 %v700_v30, %s1864_s5 }
 0x1d0   : > { %751 = vrot.lane.b32.xlu0 %v700_v30, %s1865_s30 }
 0x1d1   : > { %746 = vrot.lane.b32.xlu1 %v618_v24, %s1865_s30 }
 0x232   : > { %v716_v32 = vpop.permute.xlu0 %715 }
 0x233   : > { %719 = vst.msk [vmem:[#allocation3 + $0x8] sm:$0xff] %vm704_vm2, %v716_v32 }
 0x235   : > { %v727_v33 = vpop.permute.xlu1 %726 }
 0x236   : > { %v732_v34 = vpop.permute.xlu0 %731  ;;  %730 = vst.msk [vmem:[#allocation2 + $0x10] sm:$0xff] %vm704_vm2, %v727_v33 }
 0x237   : > { %735 = vst.msk [vmem:[#allocation3 + $0x10] sm:$0xff] %vm704_vm2, %v732_v34 }
 0x23a   : > { %v710_v35 = vpop.permute.xlu0 %709 }
 0x23b   : > { %713 = vst.msk [vmem:[#allocation2 + $0x8] sm:$0xff] %vm704_vm2, %v710_v35  ;;  %v722_v36 = vpop.permute.xlu1 %721 }
 0x23c   : > { %725 = vst.msk [vmem:[#allocation4 + $0x8] sm:$0xff] %vm704_vm2, %v722_v36 }
 0x23e   : > { %v742_v37 = vpop.permute.xlu0 %741 }
 0x23f   : > { %745 = vst.msk [vmem:[#allocation2 + $0x18] sm:$0xff] %vm704_vm2, %v742_v37  ;;  %v737_v38 = vpop.permute.xlu1 %736 }
 0x240   : > { %740 = vst.msk [vmem:[#allocation4 + $0x10] sm:$0xff] %vm704_vm2, %v737_v38 }
 0x242   : > { %v752_v39 = vpop.permute.xlu0 %751 }
 0x243   : > { %755 = vst.msk [vmem:[#allocation4 + $0x18] sm:$0xff] %vm704_vm2, %v752_v39  ;;  %v747_v40 = vpop.permute.xlu1 %746 }
 0x244   : > { %750 = vst.msk [vmem:[#allocation3 + $0x18] sm:$0xff] %vm704_vm2, %v747_v40 }
 0x245 PF: > { %s2468_s25 = sld [smem:[#allocation23_spill]]  ;;  %vm764_vm3 = vcmask 64512   ;;  %v1866_v41 = vmov 0.0   ;;  %vm1867_vm4 = vmmov 0   ;;  %s2469_s24 = sld [smem:[#allocation37_spill]] }
 0x246   : > { %1334 = vmatprep.subr.mxu0 %v1866_v41  ;;  %1336 = vmatprep.mubr.msk.f32.mxu0 %vm1867_vm4, %v1866_v41 }
 0x247   : > { %1339 = vmatprep.subr.mxu1 %v1866_v41  ;;  %1341 = vmatprep.mubr.msk.f32.mxu1 %vm1867_vm4, %v1866_v41 }
 0x24b   : > { %s2281_s10 = sshll.u32 %s2468_s25, 3  ;;  %v763_v44 = vld [vmem:[%s2469_s24] sm:$0xff]  ;;  %p1267_p12 = scmp.ne.s32.totalorder %s2468_s25, 3 }
 0x24c   : > { %s759_s3 = scalar_lea.vmem [#allocation3], %s2281_s10  ;;  %s757_s7 = scalar_lea.vmem [#allocation2], %s2281_s10  ;;  %v1869_v0 = vmov (!%p1267_p12), 0.0|0.0   ;;  %v958_v1 = vld [vmem:[#allocation14] sm:$0xff] (!%p1267_p12)  ;;  %v959_v2 = vld [vmem:[#allocation14 + $0x8] sm:$0xff] (!%p1267_p12)  ;;  %v960_v5 = vld [vmem:[#allocation14 + $0x10] sm:$0xff] (!%p1267_p12) }
 0x24d   : > { %v760_v42 = vld [vmem:[%s759_s3] sm:$0xff]  ;;  %s761_s12 = scalar_lea.vmem [#allocation4], %s2281_s10  ;;  %s928_s30 = scalar_lea.vmem [#allocation5], %s2281_s10  ;;  %v1374_v4 = vpack.c.bf16 (!%p1267_p12), %v959_v2, %v958_v1  ;;  %v961_v6 = vld [vmem:[#allocation14 + $0x18] sm:$0xff] (!%p1267_p12)  ;;  %vm1871_vm5 = vmmov (!%p1267_p12), 0   ;;  %v1872_v7 = vmov (!%p1267_p12), 0.0  }
 0x24e   : > { %1335 = vmatpush3.xpose.msk.msra.mxu0 %vm764_vm3, %v760_v42  ;;  %v758_v43 = vld [vmem:[%s757_s7] sm:$0xff]  ;;  %s1868_s3 = smov (!%p1267_p12), 8   ;;  %s1870_s7 = smov (!%p1267_p12), 24   ;;  %v1377_v8 = vpack.c.bf16 (!%p1267_p12), %v961_v6, %v960_v5  ;;  %vm954_vm6 = vcmask (!%p1267_p12), 130048   ;;  %vm956_vm7 = vcmask (!%p1267_p12), 195584   ;;  %vm969_vm8 = vcmask (!%p1267_p12), 261120  }
 0x24f   : > { %v762_v55 = vld [vmem:[%s761_s12] sm:$0xff]  ;;  %1373 = vmatprep.subr.bf16.mxu0 (!%p1267_p12), %v1869_v0  ;;  %s1873_s25 = smov (!%p1267_p12), 16   ;;  %s2470_s26 = sld [smem:[#allocation36_spill]] (!%p1267_p12) }
 0x250   : > { %1340 = vmatpush3.msra.mxu1 %v762_v55 }
 0x251   : > { %1337 = vmatmul.mubr.msk.f32.vlgmr.msra.gmra.mrb[0].mxu0 %vm764_vm3, %v758_v43 }
 0x252   : > { %1352 = vmatprep.mubr.msk.f32.mxu0 (!%p1267_p12), %vm1871_vm5, %v1872_v7  ;;  %1375 = vmatpush3.bf16.msra.mxu0 (!%p1267_p12), %v1374_v4 }
 0x253   : > { %1376 = vmatprep.subr.bf16.mxu0 (!%p1267_p12), %v1869_v0 }
 0x255   : > { %v1268_v16 = vld [vmem:[%s2470_s26] ss:$0 sm:$0xff] (!%p1267_p12) }
 0x256   : > { %1378 = vmatpush3.bf16.msra.mxu0 (!%p1267_p12), %v1377_v8 }
 0x324   : > { %v837_v45 = vpop.f32.mrb[0].mxu0 }
 0x325   : > { %v838_v46 = vadd.f32 %v837_v45, %v763_v44  ;;  %v1338_v47 = vpop.f32.mrb[1].mxu0 }
 0x327   : > { %841 = vst.msk [vmem:[%s2421_s11] sm:$0xff] %vm764_vm3, %v838_v46  ;;  %v842_v48 = vsel %vm764_vm3, %v838_v46, -inf }
 0x328   : > { %843 = vmax.xlane.f32.xlu0 %v842_v48 }
 0x3b5   : > { %v844_v49 = vpop.xlane.xlu0 %843 }
 0x3b6   : > { %v845_v50 = vmax.f32 %v844_v49, -1e+30 }
 0x3b8   : > { %v846_v51 = vsub.f32 %v838_v46, %v845_v50 }
 0x3ba   : > { %v847_v52 = vmul.f32 1.442695, %v846_v51 }
 0x3bc   : > { %1543 = vpow2.f32 %v847_v52 }
 0x3c6   : > { %v1544_v53 = vpop.eup %1543 }
 0x3c7   : > { %v849_v54 = vsel %vm764_vm3, %v1544_v53, 0.0 }
 0x3c8   : > { %850 = vadd.xlane.f32.xlu0 %v849_v54 }
 0x455   : > { %v851_v56 = vpop.xlane.xlu0 %850 }
 0x456   : > { %v852_v57 = vmax.f32 %v851_v56, 1e-30 }
 0x458   : > { %1545 = vrcp.f32 %v852_v57 }
 0x462   : > { %v1546_v58 = vpop.eup %1545 }
 0x463   : > { %v854_v59 = vmul.f32 %v1546_v58, %v1544_v53 }
 0x465   : > { %1342 = vmatmul.mubr.msk.f32.vlgmr.msra.gmra.mrb[0].mxu1 %vm764_vm3, %v854_v59 }
 0x533   : > { %933 = sbr.rel (%p1267_p12) target bundleno = 1681 (0x691), region = 84 }
 0x538   : > { %v924_v60 = vpop.f32.mrb[0].mxu1 }
 0x539   : > { %929 = vst.msk [vmem:[%s928_s30] sm:$0xff] %vm764_vm3, %v924_v60  ;;  %v1343_v61 = vpop.f32.mrb[1].mxu1 }
 0x540   : > { %v936_v62 = vld [vmem:[#allocation5 + $0x8] sm:$0xff]  ;;  %v940_v63 = vld [vmem:[#allocation5 + $0x18] sm:$0xff]  ;;  %v938_v3 = vld [vmem:[#allocation5 + $0x10] sm:$0xff] }
 0x541   : > { %942 = vrot.lane.b32.xlu0 %v936_v62, %s1868_s3  ;;  %950 = vrot.lane.b32.xlu1 %v940_v63, %s1870_s7  ;;  %v934_v10 = vld [vmem:[#allocation5] sm:$0xff] }
 0x545   : > { %946 = vrot.lane.b32.xlu0 %v938_v3, %s1873_s25 }
 0x5b3   : > { %v943_v9 = vpop.permute.xlu0 %942  ;;  %v951_v11 = vpop.permute.xlu1 %950 }
 0x5b4   : > { %v953_v12 = vsel %vm764_vm3, %v934_v10, %v943_v9 }
 0x5b7   : > { %v947_v13 = vpop.permute.xlu0 %946 }
 0x5b8   : > { %v955_v14 = vsel %vm954_vm6, %v953_v12, %v947_v13 }
 0x5b9   : > { %v957_v15 = vsel %vm956_vm7, %v955_v14, %v951_v11 }
 0x5ba   : > { %1353 = vmatmul.mubr.msk.f32.vlgmr.msra.gmra.mrb[0].mxu0 %vm969_vm8, %v957_v15 }
 0x68d   : > { %v1039_v17 = vpop.f32.mrb[0].mxu0 }
 0x68e   : > { %v1040_v18 = vadd.f32 %v1268_v16, %v1039_v17  ;;  %v1354_v19 = vpop.f32.mrb[1].mxu0 }
 0x690   : > { %1043 = vst.msk [vmem:[%s2254_s20] sm:$0xff] %vm969_vm8, %v1040_v18 }
 0x691 PF: > { %s2471_s24 = sld [smem:[#allocation24_spill]]  ;;  %s2472_s7 = sld [smem:[#allocation38_spill]] }
 0x692   : > { %s1063_s4 = sshll.u32 %s2254_s20, 4  ;;  %s1045_s11 = scalar_lea.sflag [#allocation8], %s2231_s19  ;;  %s1064_s4 = int_to_ptr.vmem [resolvable:$true] %s1063_s4 }
 0x693   : > { %s1689_s10 = scalar_lea.vmem %s1064_s4, 128  ;;  %p2473_p5 = scmp.ne.s32.totalorder %s2455_s27, 0 }
 0x694   : > { %p1690_p11 = scmp.ne.s32.totalorder %s1064_s4, %s1689_s10  ;;  %s1874_s5 = smov [#allocation15]  }
 0x695   : > { %s1693_s26 = sshll.u32 %s1874_s5, 4  ;;  %s1694_s26 = int_to_ptr.vmem [resolvable:$false] %s1693_s26 }
 0x696   : > { %p1691_p6 = pnand %p1690_p11, %p2473_p5  ;;  %s1695_s0 = scalar_lea.vmem %s1694_s26, 256 }
 0x697   : > { %s1272_s12 = sshll.u32 %s2471_s24, 7  ;;  %p1696_p3 = scmp.lt.s32.totalorder %s1064_s4, %s1694_s26 }
 0x698   : > { %s2309_s25 = scalar_lea.hbm %s2472_s7, %s1272_s12  ;;  %p1692_p10 = pneg %p1691_p6 }
 0x699   : > { %p1697_p0 = scmp.lt.s32.totalorder %s1695_s0, %s1689_s10 }
 0x69b   : > { %p1698_p8 = por %p1697_p0, %p1696_p3 }
 0x69d   : > { %p1699_p13 = pnand %p1698_p8, %p1692_p10 }
 0x69f   : > { %1702 = shalt.err (!%p1699_p13)
}
 0x6a0   : > { %s1703_s19 = scalar_lea.hbm %s2309_s25, 128  ;;  %s1707_s30 = scalar_lea.hbm %s2472_s7, 256 }
 0x6a1   : > { %p1704_p7 = scmp.ne.s32.totalorder %s2309_s25, %s1703_s19  ;;  %p1708_p4 = scmp.lt.u32.totalorder %s2309_s25, %s2472_s7 }
 0x6a2   : > { %p1709_p2 = scmp.lt.u32.totalorder %s1707_s30, %s1703_s19  ;;  %p1711_p11 = scmp.lt.u32.totalorder %s1703_s19, %s2309_s25 }
 0x6a3   : > { %p1705_p1 = pnand %p1704_p7, %p2473_p5 }
 0x6a4   : > { %p1710_p12 = por %p1709_p2, %p1708_p4 }
 0x6a5   : > { %p1706_p9 = pneg %p1705_p1 }
 0x6a6   : > { %p1712_p6 = por %p1711_p11, %p1710_p12 }
 0x6a8   : > { %p1713_p10 = pnand %p1712_p6, %p1706_p9 }
 0x6aa   : > { %1716 = shalt.err (!%p1713_p10)
}
 0x6ab   : > { %s2474_s0 = sld [smem:[#allocation23_spill]]  ;;  %s1273_s10 = sshll.u32 %s2471_s24, 2 }
 0x6ac   : > { %1397 = dma.vmem_to_hbm [thread:$0]  (%p2473_p5), %s1064_s4, 128, %s2309_s25, %s1045_s11  }
 0x6ad   : > { %s2475_s26 = scalar_lea.vmem [#allocation16], %s2252_s6  ;;  %s2476_s27 = sld [smem:[#allocation39_spill]] }
 0x6ae   : > { %s1078_s20 = sshll.u32 %s2475_s26, 4  ;;  %s2477_s7 = sand.u32 1, %s1815_s14   ;;  %s2334_s20 = int_to_ptr.vmem [resolvable:$true] %s1078_s20 }
 0x6af   : > { %s1050_s29 = scalar_lea.sflag [#allocation17], %s2477_s7  ;;  %s1717_s22 = scalar_lea.vmem %s2334_s20, 128 }
 0x6b0   : > { %p1718_p3 = scmp.ne.s32.totalorder %s2334_s20, %s1717_s22  ;;  %p2478_p0 = scmp.ne.s32.totalorder %s2458_s9, 0 }
 0x6b1   : > { %s1074_s12 = sadd.s32 %s2474_s0, %s1273_s10  ;;  %s1875_s4 = smov [#allocation16]  }
 0x6b2   : > { %s1274_s19 = sshll.u32 %s1074_s12, 7  ;;  %p1719_p5 = pnand %p1718_p3, %p2478_p0 }
 0x6b3   : > { %s1076_s5 = scalar_lea.hbm %s2476_s27, %s1274_s19  ;;  %s1721_s6 = sshll.u32 %s1875_s4, 4  ;;  %s1722_s6 = int_to_ptr.vmem [resolvable:$false] %s1721_s6 }
 0x6b4   : > { %p1720_p8 = pneg %p1719_p5  ;;  %s1723_s11 = scalar_lea.vmem %s1722_s6, 256 }
 0x6b5   : > { %p1724_p13 = scmp.lt.s32.totalorder %s2334_s20, %s1722_s6  ;;  %p1725_p7 = scmp.lt.s32.totalorder %s1723_s11, %s1717_s22 }
 0x6b7   : > { %p1726_p1 = por %p1725_p7, %p1724_p13 }
 0x6b9   : > { %p1727_p9 = pnand %p1726_p1, %p1720_p8 }
 0x6bb   : > { %1730 = shalt.err (!%p1727_p9)
}
 0x6bc   : > { %s1731_s24 = scalar_lea.hbm %s1076_s5, 128  ;;  %s1735_s0 = scalar_lea.hbm %s2476_s27, 1024 }
 0x6bd   : > { %p1732_p4 = scmp.ne.s32.totalorder %s1076_s5, %s1731_s24  ;;  %p1736_p11 = scmp.lt.u32.totalorder %s1076_s5, %s2476_s27 }
 0x6be   : > { %p1737_p6 = scmp.lt.u32.totalorder %s1735_s0, %s1731_s24  ;;  %p1739_p3 = scmp.lt.u32.totalorder %s1731_s24, %s1076_s5 }
 0x6bf   : > { %p1733_p2 = pnand %p1732_p4, %p2478_p0 }
 0x6c0   : > { %p1738_p10 = por %p1737_p6, %p1736_p11 }
 0x6c1   : > { %p1734_p12 = pneg %p1733_p2 }
 0x6c2   : > { %p1740_p5 = por %p1739_p3, %p1738_p10 }
 0x6c4   : > { %p1741_p8 = pnand %p1740_p5, %p1734_p12 }
 0x6c6   : > { %1744 = shalt.err (!%p1741_p8)
}
 0x6c7   : > { %1398 = dma.vmem_to_hbm [thread:$0]  (%p2478_p0), %s2334_s20, 128, %s1076_s5, %s1050_s29  }
 0x6c8 PF: > { %p1434_p13 = scmp.ge.s32.totalorder %s1851_s23, 2  ;;  %s1090_s22 = sand.u32 1, %s1823_s16  }
 0x6c9   : > { %p2479_p7 = scmp.ne.s32.totalorder %s2457_s28, 0  ;;  %s1091_s12 = scalar_lea.sflag [#allocation8], %s1090_s22 }
 0x6cb   : > { %p1419_p1 = pnand %p1434_p13, %p2479_p7 }
 0x6cd   : > { %1802 = dma.done.wait (!%p1419_p1), %s1091_s12, 128  }
 0x6ce   : > { %1804 = vsyncadd (!%p1419_p1), %s1091_s12, 4294967168  ;;  %s1099_s19 = sand.u32 1, %s1811_s13   ;;  %p2480_p9 = scmp.ne.s32.totalorder %s2459_s1, 0 }
 0x6cf   : > { %s1100_s30 = scalar_lea.sflag [#allocation17], %s1099_s19 }
 0x6d0   : > { %p1422_p4 = pnand %p1434_p13, %p2480_p9 }
 0x6d2   : > { %1806 = dma.done.wait (!%p1422_p4), %s1100_s30, 128  }
 0x6d3   : > { %1808 = vsyncadd (!%p1422_p4), %s1100_s30, 4294967168  ;;  %s32_s23 = sadd.s32 1, %s1851_s23   ;;  %s2481_s20 = sld [smem:[#allocation25_spill]] }
 0x6d4   : > { %p29_p0 = scmp.ge.s32.totalorder %s32_s23, 10   ;;  %s2482_s29 = sld [smem:[#allocation27_spill]] }
 0x6d5   : > { %s2483_s22 = sld [smem:[#allocation28_spill]]  ;;  %s2484_s13 = smov %s1815_s14 }
 0x6d6   : > { %s2485_s14 = smov %s1819_s15  ;;  %s2486_s15 = smov %s2174_s8 }
 0x6d7   : > { %s2487_s16 = smov %s1827_s17  ;;  %s2488_s17 = smov %s1831_s18 }
 0x6d8   : > { %s2489_s18 = smov %s2166_s2  ;;  %s2490_s19 = smov %s1843_s21 }
 0x6d9   :  { %31 = sbr.rel (!%p29_p0) target bundleno = 25 (0x19), region = 158 }
 0x6da   : > { %s2491_s21 = smov %s2482_s29 }
 0x6e0   :  { %1105 = vsyncpa [#allocation7], 1 }
 0x6e1   :  { %1107 = vsyncpa [#allocation7 + $0x1], 1 }
 0x6e2   :  { %1108 = vsyncpa [#allocation10], 1 }
 0x6e3   :  { %1109 = vsyncpa [#allocation13], 1 }
 0x6e4   :  { %1110 = vsyncpa [#allocation8], 1 }
 0x6e5   :  { %1112 = vsyncpa [#allocation8 + $0x1], 1 }
 0x6e6   :  { %1113 = vsyncpa [#allocation17], 1 }
 0x6e7   :  { %1115 = vsyncpa [#allocation17 + $0x1], 1 }

</bundles_post_ra>
